<compile_context>
chip_gen: v5e
topology: v5e:2x2
jax: 0.10.0
libtpu: 0.0.40
codegen_flags: <defaults>
</compile_context>

<pallas_src>
import math
from functools import partial

import jax
import jax.numpy as jnp
from jax import lax
from jax.experimental import pallas as pl
from jax.experimental.pallas import tpu as pltpu


# ------------------------------ tiling helpers ------------------------------ #

def _pick_tile(dim, candidates):
    """Largest candidate that exactly divides dim, else the full dim (always legal)."""
    for c in candidates:
        if c <= dim and dim % c == 0:
            return c
    return dim


def _round_up(x, m):
    return -(-x // m) * m


# ------------------------- dense (+ fused add+LN) kernel --------------------- #

def _make_dense_kernel(*, act, transpose_w, has_residual, has_ln, eps):
    def kernel(*refs):
        x_ref, w_ref, b_ref = refs[0], refs[1], refs[2]
        i = 3
        r_ref = None
        if has_residual:
            r_ref = refs[i]; i += 1
        g_ref = bb_ref = None
        if has_ln:
            g_ref, bb_ref = refs[i], refs[i + 1]; i += 2
        o_ref, acc_ref = refs[i], refs[i + 1]

        k = pl.program_id(2)

        @pl.when(k == 0)
        def _init():
            acc_ref[...] = jnp.zeros_like(acc_ref)

        if transpose_w:
            # x (tm, tk) contracted against w (tn, tk) on the last dims.  Mosaic lowers
            # this trans_b form natively on the MXU (no per-tile XLU transpose of the
            # weight block), so the tied MLM decoder never transposes the vocab table.
            acc_ref[...] += lax.dot_general(
                x_ref[...], w_ref[...], (((1,), (1,)), ((), ())),
                preferred_element_type=jnp.float32)
        else:
            acc_ref[...] += jnp.dot(x_ref[...], w_ref[...],
                                    preferred_element_type=jnp.float32)

        @pl.when(k == pl.num_programs(2) - 1)
        def _finalize():
            y = acc_ref[...] + b_ref[...].astype(jnp.float32)
            if act == "gelu_tanh":
                c = math.sqrt(2.0 / math.pi)
                y = 0.5 * y * (1.0 + jnp.tanh(c * (y + 0.044715 * y * y * y)))
            elif act == "tanh":
                y = jnp.tanh(y)
            if has_residual:
                y = y + r_ref[...].astype(jnp.float32)
            if has_ln:
                mu = jnp.mean(y, axis=-1, keepdims=True)
                yc = y - mu
                var = jnp.mean(yc * yc, axis=-1, keepdims=True)
                y = yc * lax.rsqrt(var + eps)
                y = y * g_ref[...].astype(jnp.float32) + bb_ref[...].astype(jnp.float32)
            o_ref[...] = y.astype(o_ref.dtype)

    return kernel


def dense(x, w, b, *, act="none", transpose_w=False, residual=None, ln=None,
          eps=1e-12, out_dtype=None):
    """y = x @ W + b (or x @ W^T + b), tiled on a (M, N, K) grid with f32 accumulation.

    Optional activation (gelu_tanh / tanh) and an optional fused epilogue
    y = LayerNorm(act(xW+b) + residual) — the fused path uses full-width (tn == N)
    output tiles so LN row statistics stay inside the kernel.

    If N is not a multiple of 128 (and there is no fused LN / residual), the weight
    and bias are zero-padded to a multiple of 256 so the N axis can be tiled with
    lane-dense 128-multiple blocks; the padded logit columns are sliced off after
    the call.  This keeps the vocab-size MLM decoder matmul VMEM-bounded.
    """
    M, K = x.shape
    N = w.shape[0] if transpose_w else w.shape[1]
    out_dtype = out_dtype or x.dtype
    has_res = residual is not None
    has_ln = ln is not None

    # --- lane-align N by zero-padding the weight / bias (never on fused-LN path) ---
    N_pad = N
    if (not has_ln) and (not has_res) and (N % 128 != 0):
        N_pad = _round_up(N, 256)
        pad = N_pad - N
        w = jnp.pad(w, ((0, pad), (0, 0)) if transpose_w else ((0, 0), (0, pad)))
        b = jnp.pad(b, ((0, pad),))

    tm = _pick_tile(M, (512, 256, 128, 64, 32, 16, 8))
    tk = _pick_tile(K, (512, 256, 128))
    tn = N_pad if has_ln else _pick_tile(N_pad, (512, 256, 128))
    grid = (M // tm, N_pad // tn, K // tk)

    x_spec = pl.BlockSpec((tm, tk), lambda i, j, k: (i, k))
    w_spec = (pl.BlockSpec((tn, tk), lambda i, j, k: (j, k)) if transpose_w
              else pl.BlockSpec((tk, tn), lambda i, j, k: (k, j)))
    vec_spec = pl.BlockSpec((1, tn), lambda i, j, k: (0, j))
    row_spec = pl.BlockSpec((tm, tn), lambda i, j, k: (i, j))

    in_specs = [x_spec, w_spec, vec_spec]
    args = [x, w, b.reshape(1, N_pad)]
    if has_res:
        in_specs.append(row_spec)
        args.append(residual)
    if has_ln:
        gamma, beta = ln
        in_specs += [vec_spec, vec_spec]
        args += [gamma.reshape(1, N_pad), beta.reshape(1, N_pad)]

    itemsize = jnp.dtype(x.dtype).itemsize
    osize = jnp.dtype(out_dtype).itemsize
    cost = pl.CostEstimate(
        flops=2 * M * N_pad * K,
        transcendentals=(M * N_pad if act != "none" else 0),
        bytes_accessed=(M * K + K * N_pad + (2 + int(has_res)) * M * N_pad) * itemsize)

    # Working-set estimate: double-buffered x / w / out (+ residual) + f32 accumulator.
    est = (2 * (tm * tk * itemsize + tk * tn * itemsize + tm * tn * osize)
           + tm * tn * 4
           + (2 * tm * tn * itemsize if has_res else 0)
           + 8 * tn * 4)
    vmem_limit = int(min(max(2 * est, 32 << 20), 64 << 20))

    out = pl.pallas_call(
        _make_dense_kernel(act=act, transpose_w=transpose_w,
                           has_residual=has_res, has_ln=has_ln, eps=eps),
        out_shape=jax.ShapeDtypeStruct((M, N_pad), out_dtype),
        grid=grid,
        in_specs=in_specs,
        out_specs=row_spec,
        scratch_shapes=[pltpu.VMEM((tm, tn), jnp.float32)],
        compiler_params=pltpu.CompilerParams(
            dimension_semantics=("parallel", "parallel", "arbitrary"),
            vmem_limit_bytes=vmem_limit),
        cost_estimate=cost,
    )(*args)
    if N_pad != N:
        out = out[:, :N]
    return out


# ----------------- fused embedding-sum + LayerNorm kernel -------------------- #

def _embed_ln_kernel(w_ref, t_ref, p_ref, g_ref, b_ref, o_ref, *, eps):
    x = (w_ref[...].astype(jnp.float32)
         + t_ref[...].astype(jnp.float32)
         + p_ref[...].astype(jnp.float32))
    mu = jnp.mean(x, axis=-1, keepdims=True)
    xc = x - mu
    var = jnp.mean(xc * xc, axis=-1, keepdims=True)
    y = xc * lax.rsqrt(var + eps)
    o_ref[...] = (y * g_ref[...].astype(jnp.float32)
                  + b_ref[...].astype(jnp.float32)).astype(o_ref.dtype)


def embed_layernorm(word_g, type_g, pos, gamma, beta, *, B, S, eps, pos_is_table):
    """LayerNorm(word + token_type + position) without materializing the sum in HBM.

    word_g / type_g: (B*S, H) gathered rows.  pos: either the (>=S, H) position table
    (broadcast across batch via the index map) or (B*S, H) gathered rows.
    """
    H = word_g.shape[1]
    ts = _pick_tile(S, (512, 256, 128, 64, 32, 16, 8))
    sb = S // ts
    row_map = lambda b, s: (b * sb + s, 0)
    pos_map = (lambda b, s: (s, 0)) if pos_is_table else row_map
    vec_map = lambda b, s: (0, 0)
    return pl.pallas_call(
        partial(_embed_ln_kernel, eps=eps),
        out_shape=jax.ShapeDtypeStruct((B * S, H), word_g.dtype),
        grid=(B, sb),
        in_specs=[pl.BlockSpec((ts, H), row_map),
                  pl.BlockSpec((ts, H), row_map),
                  pl.BlockSpec((ts, H), pos_map),
                  pl.BlockSpec((1, H), vec_map),
                  pl.BlockSpec((1, H), vec_map)],
        out_specs=pl.BlockSpec((ts, H), row_map),
        compiler_params=pltpu.CompilerParams(
            dimension_semantics=("parallel", "parallel")),
    )(word_g, type_g, pos, gamma.reshape(1, H), beta.reshape(1, H))


# ------------------------------ attention kernels ---------------------------- #

def _mha_heads(get_qkv, bias, heads, scale, out_dtype):
    """Shared per-head softmax(QK^T + bias)V body.  Scale is folded into Q."""
    # TODO(synk): for S >= ~1024 switch to a KV-blocked online-softmax (flash) loop so
    # the (S, S) score tile and K/V stream stay bounded in VMEM on all generations.
    outs = []
    for h in range(heads):
        q, k, v = get_qkv(h)
        q = q * scale                                            # (S, hd) bf16, cheap
        s = lax.dot_general(q, k, (((1,), (1,)), ((), ())),      # MXU, no explicit .T
                            preferred_element_type=jnp.float32) + bias
        m = jnp.max(s, axis=-1, keepdims=True)
        p = jnp.exp(s - m)
        p = p * pl.reciprocal(jnp.sum(p, axis=-1, keepdims=True), approx=True)
        outs.append(jnp.dot(p.astype(v.dtype), v, preferred_element_type=jnp.float32))
    out = outs[0] if heads == 1 else jnp.concatenate(outs, axis=-1)
    return out.astype(out_dtype)


def _attn_kernel_grouped(q_ref, k_ref, v_ref, bias_ref, o_ref, *, heads, hd, scale):
    # q/k/v refs: lane-aligned (1, S, gw) feature slices of the packed qkv slab.
    bias = bias_ref[0].astype(jnp.float32)                       # (1, S) key bias

    def get(h):
        sl = slice(h * hd, (h + 1) * hd)
        return q_ref[0, :, sl], k_ref[0, :, sl], v_ref[0, :, sl]

    o_ref[0] = _mha_heads(get, bias, heads, scale, o_ref.dtype)


def _attn_kernel_packed(qkv_ref, bias_ref, o_ref, *, heads, hd, scale):
    # Fallback for tiny configs: one (1, S, 3H) block per batch, heads unrolled.
    H = heads * hd
    bias = bias_ref[0].astype(jnp.float32)

    def get(h):
        return (qkv_ref[0, :, h * hd:(h + 1) * hd],
                qkv_ref[0, :, H + h * hd:H + (h + 1) * hd],
                qkv_ref[0, :, 2 * H + h * hd:2 * H + (h + 1) * hd])

    o_ref[0] = _mha_heads(get, bias, heads, scale, o_ref.dtype)


def attention(qkv, key_bias, num_heads):
    """qkv: (B, S, 3H) packed [q|k|v]; key_bias: (B, 1, S) additive f32 mask (0 / -1e9)."""
    B, S, H3 = qkv.shape
    H = H3 // 3
    hd = H // num_heads
    scale = 1.0 / math.sqrt(hd)
    itemsize = jnp.dtype(qkv.dtype).itemsize

    # Lane-aligned head-group width (multiple of 128 lanes) so BlockSpec DMA delivers
    # vreg-aligned Q/K/V tiles and the output store is an unmasked 128-wide vst.
    if hd % 128 == 0:
        gw = hd
    elif (128 % hd == 0) and (H % 128 == 0):
        gw = 128
    else:
        gw = 0   # tiny-config fallback: whole H per kernel instance

    cost = pl.CostEstimate(
        flops=4 * B * num_heads * S * S * hd,
        transcendentals=B * num_heads * S * S,
        bytes_accessed=(qkv.size + B * S * H) * itemsize)

    if gw:
        groups = H // gw
        hpg = gw // hd
        grid = (B, groups)
        kern = partial(_attn_kernel_grouped, heads=hpg, hd=hd, scale=scale)
        in_specs = [
            pl.BlockSpec((1, S, gw), lambda b, g: (b, 0, g)),
            pl.BlockSpec((1, S, gw), lambda b, g: (b, 0, groups + g)),
            pl.BlockSpec((1, S, gw), lambda b, g: (b, 0, 2 * groups + g)),
            pl.BlockSpec((1, 1, S), lambda b, g: (b, 0, 0)),
        ]
        out_specs = pl.BlockSpec((1, S, gw), lambda b, g: (b, 0, g))
        sem = ("parallel", "parallel")
        operands = (qkv, qkv, qkv, key_bias)
        est = 8 * S * gw * itemsize + hpg * S * S * 4 + S * S * itemsize + (1 << 20)
    else:
        grid = (B,)
        kern = partial(_attn_kernel_packed, heads=num_heads, hd=hd, scale=scale)
        in_specs = [pl.BlockSpec((1, S, 3 * H), lambda b: (b, 0, 0)),
                    pl.BlockSpec((1, 1, S), lambda b: (b, 0, 0))]
        out_specs = pl.BlockSpec((1, S, H), lambda b: (b, 0, 0))
        sem = ("parallel",)
        operands = (qkv, key_bias)
        est = (8 * S * H * itemsize + num_heads * S * S * 4
               + num_heads * S * hd * 4 + (1 << 20))

    vmem_limit = int(min(max(2 * est, 32 << 20), 64 << 20))

    return pl.pallas_call(
        kern,
        out_shape=jax.ShapeDtypeStruct((B, S, H), qkv.dtype),
        grid=grid,
        in_specs=in_specs,
        out_specs=out_specs,
        compiler_params=pltpu.CompilerParams(
            dimension_semantics=sem, vmem_limit_bytes=vmem_limit),
        cost_estimate=cost,
    )(*operands)


# ----------------------------- parameter construction ------------------------ #

def init_params(key, cfg, dtype=jnp.bfloat16):
    H = cfg["hidden_size"]
    I = cfg["intermediate_size"]
    V = cfg["vocab_size"]
    std = cfg["initializer_range"]

    def nrm(k, shape):
        return (jax.random.normal(k, shape, jnp.float32) * std).astype(dtype)

    ones = lambda s: jnp.ones(s, dtype)
    zeros = lambda s: jnp.zeros(s, dtype)

    keys = iter(jax.random.split(key, 6 + 4 * cfg["num_hidden_layers"]))
    params = {}

    word_emb = nrm(next(keys), (V, H))
    word_emb = word_emb.at[cfg["pad_token_id"]].set(0.0)       # padding_idx zeroed
    params["word_emb"] = word_emb                               # tied MLM decoder weight
    params["pos_emb"] = nrm(next(keys), (cfg["max_position_embeddings"], H))
    params["type_emb"] = nrm(next(keys), (cfg["type_vocab_size"], H))
    params["emb_ln_g"] = ones((H,))
    params["emb_ln_b"] = zeros((H,))

    layers = []
    for _ in range(cfg["num_hidden_layers"]):
        layers.append({
            "Wqkv": nrm(next(keys), (H, 3 * H)), "bqkv": zeros((3 * H,)),
            "Wout": nrm(next(keys), (H, H)),     "bout": zeros((H,)),
            "n1_g": ones((H,)), "n1_b": zeros((H,)),
            "W1": nrm(next(keys), (H, I)), "b1": zeros((I,)),
            "W2": nrm(next(keys), (I, H)), "b2": zeros((H,)),
            "n2_g": ones((H,)), "n2_b": zeros((H,)),
        })
    params["layers"] = layers

    params["pool_W"] = nrm(next(keys), (H, H))
    params["pool_b"] = zeros((H,))

    # BertPreTrainingHeads: MLM transform + tied decoder, NSP classifier.
    params["mlm_W"] = nrm(next(keys), (H, H))
    params["mlm_b"] = zeros((H,))
    params["mlm_ln_g"] = ones((H,))
    params["mlm_ln_b"] = zeros((H,))
    params["decoder_b"] = zeros((V,))
    params["nsp_W"] = nrm(next(keys), (H, 2))
    params["nsp_b"] = zeros((2,))
    return params


# --------------------------------- model forward ----------------------------- #

def bert_forward(params, input_ids, attention_mask, token_type_ids=None,
                 position_ids=None, *, cfg):
    B, S = input_ids.shape
    H = cfg["hidden_size"]
    nh = cfg["num_attention_heads"]
    eps = cfg["layer_norm_eps"]

    # --- BertEmbeddings: gathers in JAX, sum + LayerNorm fused in one kernel ---
    # TODO(synk): the row gathers themselves could move into a scalar-prefetch +
    # pl.Element kernel; left in XLA for now.
    if token_type_ids is None:
        token_type_ids = jnp.zeros((B, S), jnp.int32)
    word_g = jnp.take(params["word_emb"], input_ids.reshape(-1), axis=0)       # (B*S, H)
    type_g = jnp.take(params["type_emb"], token_type_ids.reshape(-1), axis=0)  # (B*S, H)
    if position_ids is None:
        pos_operand, pos_is_table = params["pos_emb"], True      # broadcast over batch
    else:
        pos_operand = jnp.take(params["pos_emb"], position_ids.reshape(-1), axis=0)
        pos_is_table = False
    # emb dropout is identity (eval).
    h = embed_layernorm(word_g, type_g, pos_operand,
                        params["emb_ln_g"], params["emb_ln_b"],
                        B=B, S=S, eps=eps, pos_is_table=pos_is_table)

    # key-padding mask -> additive bias, broadcast over query rows inside the kernel.
    key_bias = jnp.where(attention_mask.astype(bool), 0.0, -1e9).astype(jnp.float32)
    key_bias = key_bias.reshape(B, 1, S)

    for lp in params["layers"]:
        # --- mixer: fused-QKV MHA (non-causal); heads split inside the kernel ---
        qkv = dense(h, lp["Wqkv"], lp["bqkv"])                             # (B*S, 3H)
        ctx = attention(qkv.reshape(B, S, 3 * H), key_bias, nh)           # (B, S, H)
        ctx = ctx.reshape(B * S, H)
        # out_proj fused with dropout(id) + residual add + norm1  (post-norm block)
        h = dense(ctx, lp["Wout"], lp["bout"],
                  residual=h, ln=(lp["n1_g"], lp["n1_b"]), eps=eps)
        # --- MLP: fc1 -> gelu(tanh); fc2 fused with residual add + norm2 ---
        ff = dense(h, lp["W1"], lp["b1"], act="gelu_tanh")
        h = dense(ff, lp["W2"], lp["b2"],
                  residual=h, ln=(lp["n2_g"], lp["n2_b"]), eps=eps)

    sequence_output = h.reshape(B, S, H)

    # --- BertPooler: dense + tanh on the first token ---
    pooled_output = dense(sequence_output[:, 0], params["pool_W"], params["pool_b"],
                          act="tanh")

    # --- BertPreTrainingHeads ---
    # MLM head: transform (dense -> gelu(tanh) -> LN, fused) + decoder tied to word emb
    # (x @ word_emb^T done in-kernel via the trans_b matmul form; vocab axis is padded
    #  to a lane-aligned multiple and tiled, logits sliced back afterwards).
    t = dense(h, params["mlm_W"], params["mlm_b"], act="gelu_tanh",
              ln=(params["mlm_ln_g"], params["mlm_ln_b"]), eps=eps)
    prediction_scores = dense(t, params["word_emb"], params["decoder_b"],
                              transpose_w=True).reshape(B, S, -1)
    # NSP classifier (2-wide output, padded to a lane-aligned tile internally).
    seq_relationship_score = dense(pooled_output, params["nsp_W"], params["nsp_b"])

    return prediction_scores, seq_relationship_score


# -------------------------------------- main --------------------------------- #

if __name__ == "__main__":
    def run(cfg, B, S, key, *, use_token_type, n_pad_tokens):
        k_params, k_ids = jax.random.split(key)
        params = init_params(k_params, cfg)
        input_ids = jax.random.randint(k_ids, (B, S), 1, cfg["vocab_size"],
                                       dtype=jnp.int32)
        attention_mask = jnp.ones((B, S), jnp.int32)
        if n_pad_tokens:
            attention_mask = attention_mask.at[:, S - n_pad_tokens:].set(0)
        token_type_ids = None
        if use_token_type:
            token_type_ids = jnp.zeros((B, S), jnp.int32).at[:, S // 2:].set(1)

        fwd = jax.jit(partial(bert_forward, cfg=cfg))
        ps, nsp = fwd(params, input_ids, attention_mask, token_type_ids)
        jax.block_until_ready((ps, nsp))

        assert ps.shape == (B, S, cfg["vocab_size"])
        assert nsp.shape == (B, 2)
        assert bool(jnp.all(jnp.isfinite(ps.astype(jnp.float32))))
        assert bool(jnp.all(jnp.isfinite(nsp.astype(jnp.float32))))

    key = jax.random.PRNGKey(0)
    k1, k2 = jax.random.split(key)

    # Tiny config: exercises the whole-H attention fallback and full-dim dense tiles.
    cfg_tiny = dict(
        vocab_size=128, hidden_size=32, num_attention_heads=4, num_hidden_layers=2,
        intermediate_size=64, max_position_embeddings=64, type_vocab_size=2,
        pad_token_id=0, layer_norm_eps=1e-12, initializer_range=0.02)
    run(cfg_tiny, B=2, S=8, key=k1, use_token_type=False, n_pad_tokens=0)

    # Wider config: exercises the lane-aligned head-group attention path (hd=64 ->
    # 128-wide groups), the padded-vocab MLM decoder tiling, token-type embeddings,
    # and key-padding masking.
    cfg_wide = dict(
        vocab_size=200, hidden_size=128, num_attention_heads=2, num_hidden_layers=1,
        intermediate_size=256, max_position_embeddings=128, type_vocab_size=2,
        pad_token_id=0, layer_norm_eps=1e-12, initializer_range=0.02)
    run(cfg_wide, B=2, S=128, key=k2, use_token_type=True, n_pad_tokens=5)

    print("KERNEL_OK")
</pallas_src>

<mosaic_0001>
module attributes {stable_mosaic.version = 11 : i64} {
  func.func @_embed_ln_kernel(%arg0: i32, %arg1: i32, %arg2: memref<8x32xbf16, #tpu.memory_space<vmem>>, %arg3: memref<8x32xbf16, #tpu.memory_space<vmem>>, %arg4: memref<8x32xbf16, #tpu.memory_space<vmem>>, %arg5: memref<1x32xbf16, #tpu.memory_space<vmem>>, %arg6: memref<1x32xbf16, #tpu.memory_space<vmem>>, %arg7: memref<8x32xbf16, #tpu.memory_space<vmem>>) attributes {dimension_semantics = [#tpu.dimension_semantics<parallel>, #tpu.dimension_semantics<parallel>], iteration_bounds = array<i64: 2, 1>, scalar_prefetch = 0 : i64, scratch_operands = 0 : i64, tpu.core_type = #tpu.core_type<tc>, window_params = [{transform_indices = @transform_0, window_bounds = array<i64: 8, 32>}, {transform_indices = @transform_1, window_bounds = array<i64: 8, 32>}, {transform_indices = @transform_2, window_bounds = array<i64: 8, 32>}, {pipeline_mode = #tpu.pipeline_mode<synchronous>, transform_indices = @transform_3, window_bounds = array<i64: 1, 32>}, {pipeline_mode = #tpu.pipeline_mode<synchronous>, transform_indices = @transform_4, window_bounds = array<i64: 1, 32>}, {transform_indices = @transform_5, window_bounds = array<i64: 8, 32>}]} {
    %c0 = arith.constant 0 : index
    %c0_0 = arith.constant 0 : index
    %0 = vector.load %arg2[%c0, %c0_0] : memref<8x32xbf16, #tpu.memory_space<vmem>>, vector<8x32xbf16>
    %1 = arith.extf %0 : vector<8x32xbf16> to vector<8x32xf32>
    %c0_1 = arith.constant 0 : index
    %c0_2 = arith.constant 0 : index
    %2 = vector.load %arg3[%c0_1, %c0_2] : memref<8x32xbf16, #tpu.memory_space<vmem>>, vector<8x32xbf16>
    %3 = arith.extf %2 : vector<8x32xbf16> to vector<8x32xf32>
    %4 = arith.addf %1, %3 : vector<8x32xf32>
    %c0_3 = arith.constant 0 : index
    %c0_4 = arith.constant 0 : index
    %5 = vector.load %arg4[%c0_3, %c0_4] : memref<8x32xbf16, #tpu.memory_space<vmem>>, vector<8x32xbf16>
    %6 = arith.extf %5 : vector<8x32xbf16> to vector<8x32xf32>
    %7 = arith.addf %4, %6 : vector<8x32xf32>
    %cst = arith.constant dense<0.000000e+00> : vector<8xf32>
    %8 = vector.multi_reduction <add>, %7, %cst [1] : vector<8x32xf32> to vector<8xf32>
    %9 = vector.shape_cast %8 : vector<8xf32> to vector<8x1xf32>
    %cst_5 = arith.constant 3.200000e+01 : f32
    %10 = vector.broadcast %cst_5 : f32 to vector<8x1xf32>
    %11 = arith.divf %9, %10 : vector<8x1xf32>
    %12 = vector.broadcast %11 : vector<8x1xf32> to vector<8x32xf32>
    %13 = arith.subf %7, %12 : vector<8x32xf32>
    %14 = arith.mulf %13, %13 : vector<8x32xf32>
    %cst_6 = arith.constant dense<0.000000e+00> : vector<8xf32>
    %15 = vector.multi_reduction <add>, %14, %cst_6 [1] : vector<8x32xf32> to vector<8xf32>
    %16 = vector.shape_cast %15 : vector<8xf32> to vector<8x1xf32>
    %cst_7 = arith.constant 3.200000e+01 : f32
    %17 = vector.broadcast %cst_7 : f32 to vector<8x1xf32>
    %18 = arith.divf %16, %17 : vector<8x1xf32>
    %cst_8 = arith.constant 9.99999996E-13 : f32
    %19 = vector.broadcast %cst_8 : f32 to vector<8x1xf32>
    %20 = arith.addf %18, %19 : vector<8x1xf32>
    %21 = math.rsqrt %20 : vector<8x1xf32>
    %22 = vector.broadcast %21 : vector<8x1xf32> to vector<8x32xf32>
    %23 = arith.mulf %13, %22 : vector<8x32xf32>
    %c0_9 = arith.constant 0 : index
    %c0_10 = arith.constant 0 : index
    %24 = vector.load %arg5[%c0_9, %c0_10] : memref<1x32xbf16, #tpu.memory_space<vmem>>, vector<1x32xbf16>
    %25 = arith.extf %24 : vector<1x32xbf16> to vector<1x32xf32>
    %26 = vector.broadcast %25 : vector<1x32xf32> to vector<8x32xf32>
    %27 = arith.mulf %23, %26 : vector<8x32xf32>
    %c0_11 = arith.constant 0 : index
    %c0_12 = arith.constant 0 : index
    %28 = vector.load %arg6[%c0_11, %c0_12] : memref<1x32xbf16, #tpu.memory_space<vmem>>, vector<1x32xbf16>
    %29 = arith.extf %28 : vector<1x32xbf16> to vector<1x32xf32>
    %30 = vector.broadcast %29 : vector<1x32xf32> to vector<8x32xf32>
    %31 = arith.addf %27, %30 : vector<8x32xf32>
    %32 = arith.truncf %31 : vector<8x32xf32> to vector<8x32xbf16>
    %c0_13 = arith.constant 0 : index
    %c0_14 = arith.constant 0 : index
    %33 = vector.load %arg7[%c0_13, %c0_14] : memref<8x32xbf16, #tpu.memory_space<vmem>>, vector<8x32xbf16>
    tpu.vector_store %arg7[%c0_13, %c0_14], %32 {strides = array<i32>} : memref<8x32xbf16, #tpu.memory_space<vmem>>, vector<8x32xbf16>,
    return
  }
  func.func @transform_0(%arg0: i32, %arg1: i32) -> (i32, i32) {
    %c1_i32 = arith.constant 1 : i32
    %0 = arith.muli %arg0, %c1_i32 : i32
    %1 = arith.addi %0, %arg1 : i32
    %c0_i32 = arith.constant 0 : i32
    %c0_i32_0 = arith.constant 0 : i32
    return %1, %c0_i32 : i32, i32
  }
  func.func @transform_1(%arg0: i32, %arg1: i32) -> (i32, i32) {
    %c1_i32 = arith.constant 1 : i32
    %0 = arith.muli %arg0, %c1_i32 : i32
    %1 = arith.addi %0, %arg1 : i32
    %c0_i32 = arith.constant 0 : i32
    %c0_i32_0 = arith.constant 0 : i32
    return %1, %c0_i32 : i32, i32
  }
  func.func @transform_2(%arg0: i32, %arg1: i32) -> (i32, i32) {
    %c0_i32 = arith.constant 0 : i32
    %c0_i32_0 = arith.constant 0 : i32
    return %arg1, %c0_i32 : i32, i32
  }
  func.func @transform_3(%arg0: i32, %arg1: i32) -> (i32, i32) {
    %c0_i32 = arith.constant 0 : i32
    %c0_i32_0 = arith.constant 0 : i32
    %c0_i32_1 = arith.constant 0 : i32
    return %c0_i32, %c0_i32_0 : i32, i32
  }
  func.func @transform_4(%arg0: i32, %arg1: i32) -> (i32, i32) {
    %c0_i32 = arith.constant 0 : i32
    %c0_i32_0 = arith.constant 0 : i32
    %c0_i32_1 = arith.constant 0 : i32
    return %c0_i32, %c0_i32_0 : i32, i32
  }
  func.func @transform_5(%arg0: i32, %arg1: i32) -> (i32, i32) {
    %c1_i32 = arith.constant 1 : i32
    %0 = arith.muli %arg0, %c1_i32 : i32
    %1 = arith.addi %0, %arg1 : i32
    %c0_i32 = arith.constant 0 : i32
    %c0_i32_0 = arith.constant 0 : i32
    return %1, %c0_i32 : i32, i32
  }
}

module attributes {stable_mosaic.version = 11 : i64} {
  func.func @kernel(%arg0: i32, %arg1: i32, %arg2: i32, %arg3: memref<16x32xbf16, #tpu.memory_space<vmem>>, %arg4: memref<32x256xbf16, #tpu.memory_space<vmem>>, %arg5: memref<1x256xbf16, #tpu.memory_space<vmem>>, %arg6: memref<16x256xbf16, #tpu.memory_space<vmem>>, %arg7: memref<16x256xf32, #tpu.memory_space<vmem>>) attributes {dimension_semantics = [#tpu.dimension_semantics<parallel>, #tpu.dimension_semantics<parallel>, #tpu.dimension_semantics<arbitrary>], iteration_bounds = array<i64: 1, 1, 1>, scalar_prefetch = 0 : i64, scratch_operands = 1 : i64, tpu.core_type = #tpu.core_type<tc>, window_params = [{transform_indices = @transform_0, window_bounds = array<i64: 16, 32>}, {transform_indices = @transform_1, window_bounds = array<i64: 32, 256>}, {transform_indices = @transform_2, window_bounds = array<i64: 1, 256>}, {transform_indices = @transform_3, window_bounds = array<i64: 16, 256>}]} {
    %c0_i32 = arith.constant 0 : i32
    %0 = arith.cmpi eq, %arg2, %c0_i32 : i32
    %1 = arith.extui %0 : i1 to i32
    %c0_i32_0 = arith.constant 0 : i32
    %2 = arith.cmpi ne, %1, %c0_i32_0 : i32
    scf.if %2 {
      %cst_10 = arith.constant 0.000000e+00 : f32
      %12 = vector.broadcast %cst_10 : f32 to vector<16x256xf32>
      %c0_11 = arith.constant 0 : index
      %c0_12 = arith.constant 0 : index
      %13 = vector.load %arg7[%c0_11, %c0_12] : memref<16x256xf32, #tpu.memory_space<vmem>>, vector<16x256xf32>
      tpu.vector_store %arg7[%c0_11, %c0_12], %12 {strides = array<i32>} : memref<16x256xf32, #tpu.memory_space<vmem>>, vector<16x256xf32>,
    } else {
    }
    %c0 = arith.constant 0 : index
    %c0_1 = arith.constant 0 : index
    %3 = vector.load %arg7[%c0, %c0_1] : memref<16x256xf32, #tpu.memory_space<vmem>>, vector<16x256xf32>
    %c0_2 = arith.constant 0 : index
    %c0_3 = arith.constant 0 : index
    %4 = vector.load %arg3[%c0_2, %c0_3] : memref<16x32xbf16, #tpu.memory_space<vmem>>, vector<16x32xbf16>
    %c0_4 = arith.constant 0 : index
    %c0_5 = arith.constant 0 : index
    %5 = vector.load %arg4[%c0_4, %c0_5] : memref<32x256xbf16, #tpu.memory_space<vmem>>, vector<32x256xbf16>
    %cst = arith.constant dense<0.000000e+00> : vector<16x256xf32>
    %6 = tpu.matmul %4, %5, %cst {dimension_numbers = #tpu.dot_dimension_numbers<[1], [0], [0], [1], [0, 0, 1, 1], [], []>} : vector<16x32xbf16>, vector<32x256xbf16>, vector<16x256xf32> -> vector<16x256xf32>
    %7 = arith.addf %3, %6 : vector<16x256xf32>
    %c0_6 = arith.constant 0 : index
    %c0_7 = arith.constant 0 : index
    %8 = vector.load %arg7[%c0_6, %c0_7] : memref<16x256xf32, #tpu.memory_space<vmem>>, vector<16x256xf32>
    tpu.vector_store %arg7[%c0_6, %c0_7], %7 {strides = array<i32>} : memref<16x256xf32, #tpu.memory_space<vmem>>, vector<16x256xf32>,
    %c0_i32_8 = arith.constant 0 : i32
    %9 = arith.cmpi eq, %arg2, %c0_i32_8 : i32
    %10 = arith.extui %9 : i1 to i32
    %c0_i32_9 = arith.constant 0 : i32
    %11 = arith.cmpi ne, %10, %c0_i32_9 : i32
    scf.if %11 {
      %c0_10 = arith.constant 0 : index
      %c0_11 = arith.constant 0 : index
      %12 = vector.load %arg7[%c0_10, %c0_11] : memref<16x256xf32, #tpu.memory_space<vmem>>, vector<16x256xf32>
      %c0_12 = arith.constant 0 : index
      %c0_13 = arith.constant 0 : index
      %13 = vector.load %arg5[%c0_12, %c0_13] : memref<1x256xbf16, #tpu.memory_space<vmem>>, vector<1x256xbf16>
      %14 = arith.extf %13 : vector<1x256xbf16> to vector<1x256xf32>
      %15 = vector.broadcast %14 : vector<1x256xf32> to vector<16x256xf32>
      %16 = arith.addf %12, %15 : vector<16x256xf32>
      %17 = arith.truncf %16 : vector<16x256xf32> to vector<16x256xbf16>
      %c0_14 = arith.constant 0 : index
      %c0_15 = arith.constant 0 : index
      %18 = vector.load %arg6[%c0_14, %c0_15] : memref<16x256xbf16, #tpu.memory_space<vmem>>, vector<16x256xbf16>
      tpu.vector_store %arg6[%c0_14, %c0_15], %17 {strides = array<i32>} : memref<16x256xbf16, #tpu.memory_space<vmem>>, vector<16x256xbf16>,
    } else {
    }
    return
  }
  func.func @transform_0(%arg0: i32, %arg1: i32, %arg2: i32) -> (i32, i32) {
    %c0_i32 = arith.constant 0 : i32
    return %arg0, %arg2 : i32, i32
  }
  func.func @transform_1(%arg0: i32, %arg1: i32, %arg2: i32) -> (i32, i32) {
    %c0_i32 = arith.constant 0 : i32
    return %arg2, %arg1 : i32, i32
  }
  func.func @transform_2(%arg0: i32, %arg1: i32, %arg2: i32) -> (i32, i32) {
    %c0_i32 = arith.constant 0 : i32
    %c0_i32_0 = arith.constant 0 : i32
    return %c0_i32, %arg1 : i32, i32
  }
  func.func @transform_3(%arg0: i32, %arg1: i32, %arg2: i32) -> (i32, i32) {
    %c0_i32 = arith.constant 0 : i32
    return %arg0, %arg1 : i32, i32
  }
}

module attributes {stable_mosaic.version = 11 : i64} {
  func.func @_attn_kernel_packed(%arg0: i32, %arg1: memref<1x8x96xbf16, #tpu.memory_space<vmem>>, %arg2: memref<1x1x8xf32, #tpu.memory_space<vmem>>, %arg3: memref<1x8x32xbf16, #tpu.memory_space<vmem>>) attributes {dimension_semantics = [#tpu.dimension_semantics<parallel>], iteration_bounds = array<i64: 2>, scalar_prefetch = 0 : i64, scratch_operands = 0 : i64, tpu.core_type = #tpu.core_type<tc>, window_params = [{transform_indices = @transform_0, window_bounds = array<i64: 1, 8, 96>}, {transform_indices = @transform_1, window_bounds = array<i64: 1, 1, 8>}, {transform_indices = @transform_2, window_bounds = array<i64: 1, 8, 32>}]} {
    %c0 = arith.constant 0 : index
    %c0_0 = arith.constant 0 : index
    %c0_1 = arith.constant 0 : index
    %0 = vector.load %arg2[%c0, %c0_0, %c0_1] : memref<1x1x8xf32, #tpu.memory_space<vmem>>, vector<1x1x8xf32>
    %1 = vector.shape_cast %0 : vector<1x1x8xf32> to vector<1x8xf32>
    %c0_2 = arith.constant 0 : index
    %c0_3 = arith.constant 0 : index
    %c0_4 = arith.constant 0 : index
    %2 = vector.load %arg1[%c0_2, %c0_3, %c0_4] : memref<1x8x96xbf16, #tpu.memory_space<vmem>>, vector<1x8x8xbf16>
    %3 = vector.shape_cast %2 : vector<1x8x8xbf16> to vector<8x8xbf16>
    %c0_5 = arith.constant 0 : index
    %c0_6 = arith.constant 0 : index
    %c32 = arith.constant 32 : index
    %4 = vector.load %arg1[%c0_5, %c0_6, %c32] : memref<1x8x96xbf16, #tpu.memory_space<vmem>>, vector<1x8x8xbf16>
    %5 = vector.shape_cast %4 : vector<1x8x8xbf16> to vector<8x8xbf16>
    %c0_7 = arith.constant 0 : index
    %c0_8 = arith.constant 0 : index
    %c64 = arith.constant 64 : index
    %6 = vector.load %arg1[%c0_7, %c0_8, %c64] : memref<1x8x96xbf16, #tpu.memory_space<vmem>>, vector<1x8x8xbf16>
    %7 = vector.shape_cast %6 : vector<1x8x8xbf16> to vector<8x8xbf16>
    %cst = arith.constant 3.535160e-01 : bf16
    %8 = vector.broadcast %cst : bf16 to vector<8x8xbf16>
    %9 = arith.mulf %3, %8 : vector<8x8xbf16>
    %cst_9 = arith.constant dense<0.000000e+00> : vector<8x8xf32>
    %10 = tpu.matmul %9, %5, %cst_9 {dimension_numbers = #tpu.dot_dimension_numbers<[1], [1], [0], [0], [0, 0, 1, 0], [], []>} : vector<8x8xbf16>, vector<8x8xbf16>, vector<8x8xf32> -> vector<8x8xf32>
    %11 = vector.broadcast %1 : vector<1x8xf32> to vector<8x8xf32>
    %12 = arith.addf %10, %11 : vector<8x8xf32>
    %cst_10 = arith.constant dense<0xFF800000> : vector<8xf32>
    %13 = vector.multi_reduction <maximumf>, %12, %cst_10 [1] : vector<8x8xf32> to vector<8xf32>
    %14 = vector.shape_cast %13 : vector<8xf32> to vector<8x1xf32>
    %15 = vector.broadcast %14 : vector<8x1xf32> to vector<8x8xf32>
    %16 = arith.subf %12, %15 : vector<8x8xf32>
    %17 = math.exp %16 : vector<8x8xf32>
    %cst_11 = arith.constant dense<0.000000e+00> : vector<8xf32>
    %18 = vector.multi_reduction <add>, %17, %cst_11 [1] : vector<8x8xf32> to vector<8xf32>
    %19 = vector.shape_cast %18 : vector<8xf32> to vector<8x1xf32>
    %20 = tpu.reciprocal %19 {approx = true} : vector<8x1xf32> -> vector<8x1xf32>
    %21 = vector.broadcast %20 : vector<8x1xf32> to vector<8x8xf32>
    %22 = arith.mulf %17, %21 : vector<8x8xf32>
    %23 = arith.truncf %22 : vector<8x8xf32> to vector<8x8xbf16>
    %cst_12 = arith.constant dense<0.000000e+00> : vector<8x8xf32>
    %24 = tpu.matmul %23, %7, %cst_12 {dimension_numbers = #tpu.dot_dimension_numbers<[1], [0], [0], [1], [0, 0, 1, 1], [], []>} : vector<8x8xbf16>, vector<8x8xbf16>, vector<8x8xf32> -> vector<8x8xf32>
    %c0_13 = arith.constant 0 : index
    %c0_14 = arith.constant 0 : index
    %c8 = arith.constant 8 : index
    %25 = vector.load %arg1[%c0_13, %c0_14, %c8] : memref<1x8x96xbf16, #tpu.memory_space<vmem>>, vector<1x8x8xbf16>
    %26 = vector.shape_cast %25 : vector<1x8x8xbf16> to vector<8x8xbf16>
    %c0_15 = arith.constant 0 : index
    %c0_16 = arith.constant 0 : index
    %c40 = arith.constant 40 : index
    %27 = vector.load %arg1[%c0_15, %c0_16, %c40] : memref<1x8x96xbf16, #tpu.memory_space<vmem>>, vector<1x8x8xbf16>
    %28 = vector.shape_cast %27 : vector<1x8x8xbf16> to vector<8x8xbf16>
    %c0_17 = arith.constant 0 : index
    %c0_18 = arith.constant 0 : index
    %c72 = arith.constant 72 : index
    %29 = vector.load %arg1[%c0_17, %c0_18, %c72] : memref<1x8x96xbf16, #tpu.memory_space<vmem>>, vector<1x8x8xbf16>
    %30 = vector.shape_cast %29 : vector<1x8x8xbf16> to vector<8x8xbf16>
    %cst_19 = arith.constant 3.535160e-01 : bf16
    %31 = vector.broadcast %cst_19 : bf16 to vector<8x8xbf16>
    %32 = arith.mulf %26, %31 : vector<8x8xbf16>
    %cst_20 = arith.constant dense<0.000000e+00> : vector<8x8xf32>
    %33 = tpu.matmul %32, %28, %cst_20 {dimension_numbers = #tpu.dot_dimension_numbers<[1], [1], [0], [0], [0, 0, 1, 0], [], []>} : vector<8x8xbf16>, vector<8x8xbf16>, vector<8x8xf32> -> vector<8x8xf32>
    %34 = vector.broadcast %1 : vector<1x8xf32> to vector<8x8xf32>
    %35 = arith.addf %33, %34 : vector<8x8xf32>
    %cst_21 = arith.constant dense<0xFF800000> : vector<8xf32>
    %36 = vector.multi_reduction <maximumf>, %35, %cst_21 [1] : vector<8x8xf32> to vector<8xf32>
    %37 = vector.shape_cast %36 : vector<8xf32> to vector<8x1xf32>
    %38 = vector.broadcast %37 : vector<8x1xf32> to vector<8x8xf32>
    %39 = arith.subf %35, %38 : vector<8x8xf32>
    %40 = math.exp %39 : vector<8x8xf32>
    %cst_22 = arith.constant dense<0.000000e+00> : vector<8xf32>
    %41 = vector.multi_reduction <add>, %40, %cst_22 [1] : vector<8x8xf32> to vector<8xf32>
    %42 = vector.shape_cast %41 : vector<8xf32> to vector<8x1xf32>
    %43 = tpu.reciprocal %42 {approx = true} : vector<8x1xf32> -> vector<8x1xf32>
    %44 = vector.broadcast %43 : vector<8x1xf32> to vector<8x8xf32>
    %45 = arith.mulf %40, %44 : vector<8x8xf32>
    %46 = arith.truncf %45 : vector<8x8xf32> to vector<8x8xbf16>
    %cst_23 = arith.constant dense<0.000000e+00> : vector<8x8xf32>
    %47 = tpu.matmul %46, %30, %cst_23 {dimension_numbers = #tpu.dot_dimension_numbers<[1], [0], [0], [1], [0, 0, 1, 1], [], []>} : vector<8x8xbf16>, vector<8x8xbf16>, vector<8x8xf32> -> vector<8x8xf32>
    %c0_24 = arith.constant 0 : index
    %c0_25 = arith.constant 0 : index
    %c16 = arith.constant 16 : index
    %48 = vector.load %arg1[%c0_24, %c0_25, %c16] : memref<1x8x96xbf16, #tpu.memory_space<vmem>>, vector<1x8x8xbf16>
    %49 = vector.shape_cast %48 : vector<1x8x8xbf16> to vector<8x8xbf16>
    %c0_26 = arith.constant 0 : index
    %c0_27 = arith.constant 0 : index
    %c48 = arith.constant 48 : index
    %50 = vector.load %arg1[%c0_26, %c0_27, %c48] : memref<1x8x96xbf16, #tpu.memory_space<vmem>>, vector<1x8x8xbf16>
    %51 = vector.shape_cast %50 : vector<1x8x8xbf16> to vector<8x8xbf16>
    %c0_28 = arith.constant 0 : index
    %c0_29 = arith.constant 0 : index
    %c80 = arith.constant 80 : index
    %52 = vector.load %arg1[%c0_28, %c0_29, %c80] : memref<1x8x96xbf16, #tpu.memory_space<vmem>>, vector<1x8x8xbf16>
    %53 = vector.shape_cast %52 : vector<1x8x8xbf16> to vector<8x8xbf16>
    %cst_30 = arith.constant 3.535160e-01 : bf16
    %54 = vector.broadcast %cst_30 : bf16 to vector<8x8xbf16>
    %55 = arith.mulf %49, %54 : vector<8x8xbf16>
    %cst_31 = arith.constant dense<0.000000e+00> : vector<8x8xf32>
    %56 = tpu.matmul %55, %51, %cst_31 {dimension_numbers = #tpu.dot_dimension_numbers<[1], [1], [0], [0], [0, 0, 1, 0], [], []>} : vector<8x8xbf16>, vector<8x8xbf16>, vector<8x8xf32> -> vector<8x8xf32>
    %57 = vector.broadcast %1 : vector<1x8xf32> to vector<8x8xf32>
    %58 = arith.addf %56, %57 : vector<8x8xf32>
    %cst_32 = arith.constant dense<0xFF800000> : vector<8xf32>
    %59 = vector.multi_reduction <maximumf>, %58, %cst_32 [1] : vector<8x8xf32> to vector<8xf32>
    %60 = vector.shape_cast %59 : vector<8xf32> to vector<8x1xf32>
    %61 = vector.broadcast %60 : vector<8x1xf32> to vector<8x8xf32>
    %62 = arith.subf %58, %61 : vector<8x8xf32>
    %63 = math.exp %62 : vector<8x8xf32>
    %cst_33 = arith.constant dense<0.000000e+00> : vector<8xf32>
    %64 = vector.multi_reduction <add>, %63, %cst_33 [1] : vector<8x8xf32> to vector<8xf32>
    %65 = vector.shape_cast %64 : vector<8xf32> to vector<8x1xf32>
    %66 = tpu.reciprocal %65 {approx = true} : vector<8x1xf32> -> vector<8x1xf32>
    %67 = vector.broadcast %66 : vector<8x1xf32> to vector<8x8xf32>
    %68 = arith.mulf %63, %67 : vector<8x8xf32>
    %69 = arith.truncf %68 : vector<8x8xf32> to vector<8x8xbf16>
    %cst_34 = arith.constant dense<0.000000e+00> : vector<8x8xf32>
    %70 = tpu.matmul %69, %53, %cst_34 {dimension_numbers = #tpu.dot_dimension_numbers<[1], [0], [0], [1], [0, 0, 1, 1], [], []>} : vector<8x8xbf16>, vector<8x8xbf16>, vector<8x8xf32> -> vector<8x8xf32>
    %c0_35 = arith.constant 0 : index
    %c0_36 = arith.constant 0 : index
    %c24 = arith.constant 24 : index
    %71 = vector.load %arg1[%c0_35, %c0_36, %c24] : memref<1x8x96xbf16, #tpu.memory_space<vmem>>, vector<1x8x8xbf16>
    %72 = vector.shape_cast %71 : vector<1x8x8xbf16> to vector<8x8xbf16>
    %c0_37 = arith.constant 0 : index
    %c0_38 = arith.constant 0 : index
    %c56 = arith.constant 56 : index
    %73 = vector.load %arg1[%c0_37, %c0_38, %c56] : memref<1x8x96xbf16, #tpu.memory_space<vmem>>, vector<1x8x8xbf16>
    %74 = vector.shape_cast %73 : vector<1x8x8xbf16> to vector<8x8xbf16>
    %c0_39 = arith.constant 0 : index
    %c0_40 = arith.constant 0 : index
    %c88 = arith.constant 88 : index
    %75 = vector.load %arg1[%c0_39, %c0_40, %c88] : memref<1x8x96xbf16, #tpu.memory_space<vmem>>, vector<1x8x8xbf16>
    %76 = vector.shape_cast %75 : vector<1x8x8xbf16> to vector<8x8xbf16>
    %cst_41 = arith.constant 3.535160e-01 : bf16
    %77 = vector.broadcast %cst_41 : bf16 to vector<8x8xbf16>
    %78 = arith.mulf %72, %77 : vector<8x8xbf16>
    %cst_42 = arith.constant dense<0.000000e+00> : vector<8x8xf32>
    %79 = tpu.matmul %78, %74, %cst_42 {dimension_numbers = #tpu.dot_dimension_numbers<[1], [1], [0], [0], [0, 0, 1, 0], [], []>} : vector<8x8xbf16>, vector<8x8xbf16>, vector<8x8xf32> -> vector<8x8xf32>
    %80 = vector.broadcast %1 : vector<1x8xf32> to vector<8x8xf32>
    %81 = arith.addf %79, %80 : vector<8x8xf32>
    %cst_43 = arith.constant dense<0xFF800000> : vector<8xf32>
    %82 = vector.multi_reduction <maximumf>, %81, %cst_43 [1] : vector<8x8xf32> to vector<8xf32>
    %83 = vector.shape_cast %82 : vector<8xf32> to vector<8x1xf32>
    %84 = vector.broadcast %83 : vector<8x1xf32> to vector<8x8xf32>
    %85 = arith.subf %81, %84 : vector<8x8xf32>
    %86 = math.exp %85 : vector<8x8xf32>
    %cst_44 = arith.constant dense<0.000000e+00> : vector<8xf32>
    %87 = vector.multi_reduction <add>, %86, %cst_44 [1] : vector<8x8xf32> to vector<8xf32>
    %88 = vector.shape_cast %87 : vector<8xf32> to vector<8x1xf32>
    %89 = tpu.reciprocal %88 {approx = true} : vector<8x1xf32> -> vector<8x1xf32>
    %90 = vector.broadcast %89 : vector<8x1xf32> to vector<8x8xf32>
    %91 = arith.mulf %86, %90 : vector<8x8xf32>
    %92 = arith.truncf %91 : vector<8x8xf32> to vector<8x8xbf16>
    %cst_45 = arith.constant dense<0.000000e+00> : vector<8x8xf32>
    %93 = tpu.matmul %92, %76, %cst_45 {dimension_numbers = #tpu.dot_dimension_numbers<[1], [0], [0], [1], [0, 0, 1, 1], [], []>} : vector<8x8xbf16>, vector<8x8xbf16>, vector<8x8xf32> -> vector<8x8xf32>
    %94 = tpu.concatenate %24, %47, %70, %93 in 1 : vector<8x8xf32>, vector<8x8xf32>, vector<8x8xf32>, vector<8x8xf32> -> vector<8x32xf32>
    %95 = arith.truncf %94 : vector<8x32xf32> to vector<8x32xbf16>
    %c0_46 = arith.constant 0 : index
    %c0_47 = arith.constant 0 : index
    %c0_48 = arith.constant 0 : index
    %96 = vector.load %arg3[%c0_46, %c0_47, %c0_48] : memref<1x8x32xbf16, #tpu.memory_space<vmem>>, vector<1x8x32xbf16>
    %97 = vector.shape_cast %96 : vector<1x8x32xbf16> to vector<8x32xbf16>
    %98 = vector.shape_cast %95 : vector<8x32xbf16> to vector<1x8x32xbf16>
    tpu.vector_store %arg3[%c0_46, %c0_47, %c0_48], %98 {strides = array<i32>} : memref<1x8x32xbf16, #tpu.memory_space<vmem>>, vector<1x8x32xbf16>,
    return
  }
  func.func @transform_0(%arg0: i32) -> (i32, i32, i32) {
    %c0_i32 = arith.constant 0 : i32
    %c0_i32_0 = arith.constant 0 : i32
    %c0_i32_1 = arith.constant 0 : i32
    return %arg0, %c0_i32, %c0_i32_0 : i32, i32, i32
  }
  func.func @transform_1(%arg0: i32) -> (i32, i32, i32) {
    %c0_i32 = arith.constant 0 : i32
    %c0_i32_0 = arith.constant 0 : i32
    %c0_i32_1 = arith.constant 0 : i32
    return %arg0, %c0_i32, %c0_i32_0 : i32, i32, i32
  }
  func.func @transform_2(%arg0: i32) -> (i32, i32, i32) {
    %c0_i32 = arith.constant 0 : i32
    %c0_i32_0 = arith.constant 0 : i32
    %c0_i32_1 = arith.constant 0 : i32
    return %arg0, %c0_i32, %c0_i32_0 : i32, i32, i32
  }
}

module attributes {stable_mosaic.version = 11 : i64} {
  func.func @kernel(%arg0: i32, %arg1: i32, %arg2: i32, %arg3: memref<16x32xbf16, #tpu.memory_space<vmem>>, %arg4: memref<32x32xbf16, #tpu.memory_space<vmem>>, %arg5: memref<1x32xbf16, #tpu.memory_space<vmem>>, %arg6: memref<16x32xbf16, #tpu.memory_space<vmem>>, %arg7: memref<1x32xbf16, #tpu.memory_space<vmem>>, %arg8: memref<1x32xbf16, #tpu.memory_space<vmem>>, %arg9: memref<16x32xbf16, #tpu.memory_space<vmem>>, %arg10: memref<16x32xf32, #tpu.memory_space<vmem>>) attributes {dimension_semantics = [#tpu.dimension_semantics<parallel>, #tpu.dimension_semantics<parallel>, #tpu.dimension_semantics<arbitrary>], iteration_bounds = array<i64: 1, 1, 1>, scalar_prefetch = 0 : i64, scratch_operands = 1 : i64, tpu.core_type = #tpu.core_type<tc>, window_params = [{transform_indices = @transform_0, window_bounds = array<i64: 16, 32>}, {transform_indices = @transform_1, window_bounds = array<i64: 32, 32>}, {transform_indices = @transform_2, window_bounds = array<i64: 1, 32>}, {transform_indices = @transform_3, window_bounds = array<i64: 16, 32>}, {transform_indices = @transform_4, window_bounds = array<i64: 1, 32>}, {transform_indices = @transform_5, window_bounds = array<i64: 1, 32>}, {transform_indices = @transform_6, window_bounds = array<i64: 16, 32>}]} {
    %c0_i32 = arith.constant 0 : i32
    %0 = arith.cmpi eq, %arg2, %c0_i32 : i32
    %1 = arith.extui %0 : i1 to i32
    %c0_i32_0 = arith.constant 0 : i32
    %2 = arith.cmpi ne, %1, %c0_i32_0 : i32
    scf.if %2 {
      %cst_10 = arith.constant 0.000000e+00 : f32
      %12 = vector.broadcast %cst_10 : f32 to vector<16x32xf32>
      %c0_11 = arith.constant 0 : index
      %c0_12 = arith.constant 0 : index
      %13 = vector.load %arg10[%c0_11, %c0_12] : memref<16x32xf32, #tpu.memory_space<vmem>>, vector<16x32xf32>
      tpu.vector_store %arg10[%c0_11, %c0_12], %12 {strides = array<i32>} : memref<16x32xf32, #tpu.memory_space<vmem>>, vector<16x32xf32>,
    } else {
    }
    %c0 = arith.constant 0 : index
    %c0_1 = arith.constant 0 : index
    %3 = vector.load %arg10[%c0, %c0_1] : memref<16x32xf32, #tpu.memory_space<vmem>>, vector<16x32xf32>
    %c0_2 = arith.constant 0 : index
    %c0_3 = arith.constant 0 : index
    %4 = vector.load %arg3[%c0_2, %c0_3] : memref<16x32xbf16, #tpu.memory_space<vmem>>, vector<16x32xbf16>
    %c0_4 = arith.constant 0 : index
    %c0_5 = arith.constant 0 : index
    %5 = vector.load %arg4[%c0_4, %c0_5] : memref<32x32xbf16, #tpu.memory_space<vmem>>, vector<32x32xbf16>
    %cst = arith.constant dense<0.000000e+00> : vector<16x32xf32>
    %6 = tpu.matmul %4, %5, %cst {dimension_numbers = #tpu.dot_dimension_numbers<[1], [0], [0], [1], [0, 0, 1, 1], [], []>} : vector<16x32xbf16>, vector<32x32xbf16>, vector<16x32xf32> -> vector<16x32xf32>
    %7 = arith.addf %3, %6 : vector<16x32xf32>
    %c0_6 = arith.constant 0 : index
    %c0_7 = arith.constant 0 : index
    %8 = vector.load %arg10[%c0_6, %c0_7] : memref<16x32xf32, #tpu.memory_space<vmem>>, vector<16x32xf32>
    tpu.vector_store %arg10[%c0_6, %c0_7], %7 {strides = array<i32>} : memref<16x32xf32, #tpu.memory_space<vmem>>, vector<16x32xf32>,
    %c0_i32_8 = arith.constant 0 : i32
    %9 = arith.cmpi eq, %arg2, %c0_i32_8 : i32
    %10 = arith.extui %9 : i1 to i32
    %c0_i32_9 = arith.constant 0 : i32
    %11 = arith.cmpi ne, %10, %c0_i32_9 : i32
    scf.if %11 {
      %c0_10 = arith.constant 0 : index
      %c0_11 = arith.constant 0 : index
      %12 = vector.load %arg10[%c0_10, %c0_11] : memref<16x32xf32, #tpu.memory_space<vmem>>, vector<16x32xf32>
      %c0_12 = arith.constant 0 : index
      %c0_13 = arith.constant 0 : index
      %13 = vector.load %arg5[%c0_12, %c0_13] : memref<1x32xbf16, #tpu.memory_space<vmem>>, vector<1x32xbf16>
      %14 = arith.extf %13 : vector<1x32xbf16> to vector<1x32xf32>
      %15 = vector.broadcast %14 : vector<1x32xf32> to vector<16x32xf32>
      %16 = arith.addf %12, %15 : vector<16x32xf32>
      %c0_14 = arith.constant 0 : index
      %c0_15 = arith.constant 0 : index
      %17 = vector.load %arg6[%c0_14, %c0_15] : memref<16x32xbf16, #tpu.memory_space<vmem>>, vector<16x32xbf16>
      %18 = arith.extf %17 : vector<16x32xbf16> to vector<16x32xf32>
      %19 = arith.addf %16, %18 : vector<16x32xf32>
      %cst_16 = arith.constant dense<0.000000e+00> : vector<16xf32>
      %20 = vector.multi_reduction <add>, %19, %cst_16 [1] : vector<16x32xf32> to vector<16xf32>
      %21 = vector.shape_cast %20 : vector<16xf32> to vector<16x1xf32>
      %cst_17 = arith.constant 3.200000e+01 : f32
      %22 = vector.broadcast %cst_17 : f32 to vector<16x1xf32>
      %23 = arith.divf %21, %22 : vector<16x1xf32>
      %24 = vector.broadcast %23 : vector<16x1xf32> to vector<16x32xf32>
      %25 = arith.subf %19, %24 : vector<16x32xf32>
      %26 = arith.mulf %25, %25 : vector<16x32xf32>
      %cst_18 = arith.constant dense<0.000000e+00> : vector<16xf32>
      %27 = vector.multi_reduction <add>, %26, %cst_18 [1] : vector<16x32xf32> to vector<16xf32>
      %28 = vector.shape_cast %27 : vector<16xf32> to vector<16x1xf32>
      %cst_19 = arith.constant 3.200000e+01 : f32
      %29 = vector.broadcast %cst_19 : f32 to vector<16x1xf32>
      %30 = arith.divf %28, %29 : vector<16x1xf32>
      %cst_20 = arith.constant 9.99999996E-13 : f32
      %31 = vector.broadcast %cst_20 : f32 to vector<16x1xf32>
      %32 = arith.addf %30, %31 : vector<16x1xf32>
      %33 = math.rsqrt %32 : vector<16x1xf32>
      %34 = vector.broadcast %33 : vector<16x1xf32> to vector<16x32xf32>
      %35 = arith.mulf %25, %34 : vector<16x32xf32>
      %c0_21 = arith.constant 0 : index
      %c0_22 = arith.constant 0 : index
      %36 = vector.load %arg7[%c0_21, %c0_22] : memref<1x32xbf16, #tpu.memory_space<vmem>>, vector<1x32xbf16>
      %37 = arith.extf %36 : vector<1x32xbf16> to vector<1x32xf32>
      %38 = vector.broadcast %37 : vector<1x32xf32> to vector<16x32xf32>
      %39 = arith.mulf %35, %38 : vector<16x32xf32>
      %c0_23 = arith.constant 0 : index
      %c0_24 = arith.constant 0 : index
      %40 = vector.load %arg8[%c0_23, %c0_24] : memref<1x32xbf16, #tpu.memory_space<vmem>>, vector<1x32xbf16>
      %41 = arith.extf %40 : vector<1x32xbf16> to vector<1x32xf32>
      %42 = vector.broadcast %41 : vector<1x32xf32> to vector<16x32xf32>
      %43 = arith.addf %39, %42 : vector<16x32xf32>
      %44 = arith.truncf %43 : vector<16x32xf32> to vector<16x32xbf16>
      %c0_25 = arith.constant 0 : index
      %c0_26 = arith.constant 0 : index
      %45 = vector.load %arg9[%c0_25, %c0_26] : memref<16x32xbf16, #tpu.memory_space<vmem>>, vector<16x32xbf16>
      tpu.vector_store %arg9[%c0_25, %c0_26], %44 {strides = array<i32>} : memref<16x32xbf16, #tpu.memory_space<vmem>>, vector<16x32xbf16>,
    } else {
    }
    return
  }
  func.func @transform_0(%arg0: i32, %arg1: i32, %arg2: i32) -> (i32, i32) {
    %c0_i32 = arith.constant 0 : i32
    return %arg0, %arg2 : i32, i32
  }
  func.func @transform_1(%arg0: i32, %arg1: i32, %arg2: i32) -> (i32, i32) {
    %c0_i32 = arith.constant 0 : i32
    return %arg2, %arg1 : i32, i32
  }
  func.func @transform_2(%arg0: i32, %arg1: i32, %arg2: i32) -> (i32, i32) {
    %c0_i32 = arith.constant 0 : i32
    %c0_i32_0 = arith.constant 0 : i32
    return %c0_i32, %arg1 : i32, i32
  }
  func.func @transform_3(%arg0: i32, %arg1: i32, %arg2: i32) -> (i32, i32) {
    %c0_i32 = arith.constant 0 : i32
    return %arg0, %arg1 : i32, i32
  }
  func.func @transform_4(%arg0: i32, %arg1: i32, %arg2: i32) -> (i32, i32) {
    %c0_i32 = arith.constant 0 : i32
    %c0_i32_0 = arith.constant 0 : i32
    return %c0_i32, %arg1 : i32, i32
  }
  func.func @transform_5(%arg0: i32, %arg1: i32, %arg2: i32) -> (i32, i32) {
    %c0_i32 = arith.constant 0 : i32
    %c0_i32_0 = arith.constant 0 : i32
    return %c0_i32, %arg1 : i32, i32
  }
  func.func @transform_6(%arg0: i32, %arg1: i32, %arg2: i32) -> (i32, i32) {
    %c0_i32 = arith.constant 0 : i32
    return %arg0, %arg1 : i32, i32
  }
}

module attributes {stable_mosaic.version = 11 : i64} {
  func.func @kernel(%arg0: i32, %arg1: i32, %arg2: i32, %arg3: memref<16x32xbf16, #tpu.memory_space<vmem>>, %arg4: memref<32x256xbf16, #tpu.memory_space<vmem>>, %arg5: memref<1x256xbf16, #tpu.memory_space<vmem>>, %arg6: memref<16x256xbf16, #tpu.memory_space<vmem>>, %arg7: memref<16x256xf32, #tpu.memory_space<vmem>>) attributes {dimension_semantics = [#tpu.dimension_semantics<parallel>, #tpu.dimension_semantics<parallel>, #tpu.dimension_semantics<arbitrary>], iteration_bounds = array<i64: 1, 1, 1>, scalar_prefetch = 0 : i64, scratch_operands = 1 : i64, tpu.core_type = #tpu.core_type<tc>, window_params = [{transform_indices = @transform_0, window_bounds = array<i64: 16, 32>}, {transform_indices = @transform_1, window_bounds = array<i64: 32, 256>}, {transform_indices = @transform_2, window_bounds = array<i64: 1, 256>}, {transform_indices = @transform_3, window_bounds = array<i64: 16, 256>}]} {
    %c0_i32 = arith.constant 0 : i32
    %0 = arith.cmpi eq, %arg2, %c0_i32 : i32
    %1 = arith.extui %0 : i1 to i32
    %c0_i32_0 = arith.constant 0 : i32
    %2 = arith.cmpi ne, %1, %c0_i32_0 : i32
    scf.if %2 {
      %cst_10 = arith.constant 0.000000e+00 : f32
      %12 = vector.broadcast %cst_10 : f32 to vector<16x256xf32>
      %c0_11 = arith.constant 0 : index
      %c0_12 = arith.constant 0 : index
      %13 = vector.load %arg7[%c0_11, %c0_12] : memref<16x256xf32, #tpu.memory_space<vmem>>, vector<16x256xf32>
      tpu.vector_store %arg7[%c0_11, %c0_12], %12 {strides = array<i32>} : memref<16x256xf32, #tpu.memory_space<vmem>>, vector<16x256xf32>,
    } else {
    }
    %c0 = arith.constant 0 : index
    %c0_1 = arith.constant 0 : index
    %3 = vector.load %arg7[%c0, %c0_1] : memref<16x256xf32, #tpu.memory_space<vmem>>, vector<16x256xf32>
    %c0_2 = arith.constant 0 : index
    %c0_3 = arith.constant 0 : index
    %4 = vector.load %arg3[%c0_2, %c0_3] : memref<16x32xbf16, #tpu.memory_space<vmem>>, vector<16x32xbf16>
    %c0_4 = arith.constant 0 : index
    %c0_5 = arith.constant 0 : index
    %5 = vector.load %arg4[%c0_4, %c0_5] : memref<32x256xbf16, #tpu.memory_space<vmem>>, vector<32x256xbf16>
    %cst = arith.constant dense<0.000000e+00> : vector<16x256xf32>
    %6 = tpu.matmul %4, %5, %cst {dimension_numbers = #tpu.dot_dimension_numbers<[1], [0], [0], [1], [0, 0, 1, 1], [], []>} : vector<16x32xbf16>, vector<32x256xbf16>, vector<16x256xf32> -> vector<16x256xf32>
    %7 = arith.addf %3, %6 : vector<16x256xf32>
    %c0_6 = arith.constant 0 : index
    %c0_7 = arith.constant 0 : index
    %8 = vector.load %arg7[%c0_6, %c0_7] : memref<16x256xf32, #tpu.memory_space<vmem>>, vector<16x256xf32>
    tpu.vector_store %arg7[%c0_6, %c0_7], %7 {strides = array<i32>} : memref<16x256xf32, #tpu.memory_space<vmem>>, vector<16x256xf32>,
    %c0_i32_8 = arith.constant 0 : i32
    %9 = arith.cmpi eq, %arg2, %c0_i32_8 : i32
    %10 = arith.extui %9 : i1 to i32
    %c0_i32_9 = arith.constant 0 : i32
    %11 = arith.cmpi ne, %10, %c0_i32_9 : i32
    scf.if %11 {
      %c0_10 = arith.constant 0 : index
      %c0_11 = arith.constant 0 : index
      %12 = vector.load %arg7[%c0_10, %c0_11] : memref<16x256xf32, #tpu.memory_space<vmem>>, vector<16x256xf32>
      %c0_12 = arith.constant 0 : index
      %c0_13 = arith.constant 0 : index
      %13 = vector.load %arg5[%c0_12, %c0_13] : memref<1x256xbf16, #tpu.memory_space<vmem>>, vector<1x256xbf16>
      %14 = arith.extf %13 : vector<1x256xbf16> to vector<1x256xf32>
      %15 = vector.broadcast %14 : vector<1x256xf32> to vector<16x256xf32>
      %16 = arith.addf %12, %15 : vector<16x256xf32>
      %cst_14 = arith.constant 5.000000e-01 : f32
      %17 = vector.broadcast %cst_14 : f32 to vector<16x256xf32>
      %18 = arith.mulf %17, %16 : vector<16x256xf32>
      %cst_15 = arith.constant 4.471500e-02 : f32
      %19 = vector.broadcast %cst_15 : f32 to vector<16x256xf32>
      %20 = arith.mulf %19, %16 : vector<16x256xf32>
      %21 = arith.mulf %20, %16 : vector<16x256xf32>
      %22 = arith.mulf %21, %16 : vector<16x256xf32>
      %23 = arith.addf %16, %22 : vector<16x256xf32>
      %cst_16 = arith.constant 0.797884583 : f32
      %24 = vector.broadcast %cst_16 : f32 to vector<16x256xf32>
      %25 = arith.mulf %24, %23 : vector<16x256xf32>
      %26 = math.tanh %25 : vector<16x256xf32>
      %cst_17 = arith.constant 1.000000e+00 : f32
      %27 = vector.broadcast %cst_17 : f32 to vector<16x256xf32>
      %28 = arith.addf %27, %26 : vector<16x256xf32>
      %29 = arith.mulf %18, %28 : vector<16x256xf32>
      %30 = arith.truncf %29 : vector<16x256xf32> to vector<16x256xbf16>
      %c0_18 = arith.constant 0 : index
      %c0_19 = arith.constant 0 : index
      %31 = vector.load %arg6[%c0_18, %c0_19] : memref<16x256xbf16, #tpu.memory_space<vmem>>, vector<16x256xbf16>
      tpu.vector_store %arg6[%c0_18, %c0_19], %30 {strides = array<i32>} : memref<16x256xbf16, #tpu.memory_space<vmem>>, vector<16x256xbf16>,
    } else {
    }
    return
  }
  func.func @transform_0(%arg0: i32, %arg1: i32, %arg2: i32) -> (i32, i32) {
    %c0_i32 = arith.constant 0 : i32
    return %arg0, %arg2 : i32, i32
  }
  func.func @transform_1(%arg0: i32, %arg1: i32, %arg2: i32) -> (i32, i32) {
    %c0_i32 = arith.constant 0 : i32
    return %arg2, %arg1 : i32, i32
  }
  func.func @transform_2(%arg0: i32, %arg1: i32, %arg2: i32) -> (i32, i32) {
    %c0_i32 = arith.constant 0 : i32
    %c0_i32_0 = arith.constant 0 : i32
    return %c0_i32, %arg1 : i32, i32
  }
  func.func @transform_3(%arg0: i32, %arg1: i32, %arg2: i32) -> (i32, i32) {
    %c0_i32 = arith.constant 0 : i32
    return %arg0, %arg1 : i32, i32
  }
}

module attributes {stable_mosaic.version = 11 : i64} {
  func.func @kernel(%arg0: i32, %arg1: i32, %arg2: i32, %arg3: memref<16x64xbf16, #tpu.memory_space<vmem>>, %arg4: memref<64x32xbf16, #tpu.memory_space<vmem>>, %arg5: memref<1x32xbf16, #tpu.memory_space<vmem>>, %arg6: memref<16x32xbf16, #tpu.memory_space<vmem>>, %arg7: memref<1x32xbf16, #tpu.memory_space<vmem>>, %arg8: memref<1x32xbf16, #tpu.memory_space<vmem>>, %arg9: memref<16x32xbf16, #tpu.memory_space<vmem>>, %arg10: memref<16x32xf32, #tpu.memory_space<vmem>>) attributes {dimension_semantics = [#tpu.dimension_semantics<parallel>, #tpu.dimension_semantics<parallel>, #tpu.dimension_semantics<arbitrary>], iteration_bounds = array<i64: 1, 1, 1>, scalar_prefetch = 0 : i64, scratch_operands = 1 : i64, tpu.core_type = #tpu.core_type<tc>, window_params = [{transform_indices = @transform_0, window_bounds = array<i64: 16, 64>}, {transform_indices = @transform_1, window_bounds = array<i64: 64, 32>}, {transform_indices = @transform_2, window_bounds = array<i64: 1, 32>}, {transform_indices = @transform_3, window_bounds = array<i64: 16, 32>}, {transform_indices = @transform_4, window_bounds = array<i64: 1, 32>}, {transform_indices = @transform_5, window_bounds = array<i64: 1, 32>}, {transform_indices = @transform_6, window_bounds = array<i64: 16, 32>}]} {
    %c0_i32 = arith.constant 0 : i32
    %0 = arith.cmpi eq, %arg2, %c0_i32 : i32
    %1 = arith.extui %0 : i1 to i32
    %c0_i32_0 = arith.constant 0 : i32
    %2 = arith.cmpi ne, %1, %c0_i32_0 : i32
    scf.if %2 {
      %cst_10 = arith.constant 0.000000e+00 : f32
      %12 = vector.broadcast %cst_10 : f32 to vector<16x32xf32>
      %c0_11 = arith.constant 0 : index
      %c0_12 = arith.constant 0 : index
      %13 = vector.load %arg10[%c0_11, %c0_12] : memref<16x32xf32, #tpu.memory_space<vmem>>, vector<16x32xf32>
      tpu.vector_store %arg10[%c0_11, %c0_12], %12 {strides = array<i32>} : memref<16x32xf32, #tpu.memory_space<vmem>>, vector<16x32xf32>,
    } else {
    }
    %c0 = arith.constant 0 : index
    %c0_1 = arith.constant 0 : index
    %3 = vector.load %arg10[%c0, %c0_1] : memref<16x32xf32, #tpu.memory_space<vmem>>, vector<16x32xf32>
    %c0_2 = arith.constant 0 : index
    %c0_3 = arith.constant 0 : index
    %4 = vector.load %arg3[%c0_2, %c0_3] : memref<16x64xbf16, #tpu.memory_space<vmem>>, vector<16x64xbf16>
    %c0_4 = arith.constant 0 : index
    %c0_5 = arith.constant 0 : index
    %5 = vector.load %arg4[%c0_4, %c0_5] : memref<64x32xbf16, #tpu.memory_space<vmem>>, vector<64x32xbf16>
    %cst = arith.constant dense<0.000000e+00> : vector<16x32xf32>
    %6 = tpu.matmul %4, %5, %cst {dimension_numbers = #tpu.dot_dimension_numbers<[1], [0], [0], [1], [0, 0, 1, 1], [], []>} : vector<16x64xbf16>, vector<64x32xbf16>, vector<16x32xf32> -> vector<16x32xf32>
    %7 = arith.addf %3, %6 : vector<16x32xf32>
    %c0_6 = arith.constant 0 : index
    %c0_7 = arith.constant 0 : index
    %8 = vector.load %arg10[%c0_6, %c0_7] : memref<16x32xf32, #tpu.memory_space<vmem>>, vector<16x32xf32>
    tpu.vector_store %arg10[%c0_6, %c0_7], %7 {strides = array<i32>} : memref<16x32xf32, #tpu.memory_space<vmem>>, vector<16x32xf32>,
    %c0_i32_8 = arith.constant 0 : i32
    %9 = arith.cmpi eq, %arg2, %c0_i32_8 : i32
    %10 = arith.extui %9 : i1 to i32
    %c0_i32_9 = arith.constant 0 : i32
    %11 = arith.cmpi ne, %10, %c0_i32_9 : i32
    scf.if %11 {
      %c0_10 = arith.constant 0 : index
      %c0_11 = arith.constant 0 : index
      %12 = vector.load %arg10[%c0_10, %c0_11] : memref<16x32xf32, #tpu.memory_space<vmem>>, vector<16x32xf32>
      %c0_12 = arith.constant 0 : index
      %c0_13 = arith.constant 0 : index
      %13 = vector.load %arg5[%c0_12, %c0_13] : memref<1x32xbf16, #tpu.memory_space<vmem>>, vector<1x32xbf16>
      %14 = arith.extf %13 : vector<1x32xbf16> to vector<1x32xf32>
      %15 = vector.broadcast %14 : vector<1x32xf32> to vector<16x32xf32>
      %16 = arith.addf %12, %15 : vector<16x32xf32>
      %c0_14 = arith.constant 0 : index
      %c0_15 = arith.constant 0 : index
      %17 = vector.load %arg6[%c0_14, %c0_15] : memref<16x32xbf16, #tpu.memory_space<vmem>>, vector<16x32xbf16>
      %18 = arith.extf %17 : vector<16x32xbf16> to vector<16x32xf32>
      %19 = arith.addf %16, %18 : vector<16x32xf32>
      %cst_16 = arith.constant dense<0.000000e+00> : vector<16xf32>
      %20 = vector.multi_reduction <add>, %19, %cst_16 [1] : vector<16x32xf32> to vector<16xf32>
      %21 = vector.shape_cast %20 : vector<16xf32> to vector<16x1xf32>
      %cst_17 = arith.constant 3.200000e+01 : f32
      %22 = vector.broadcast %cst_17 : f32 to vector<16x1xf32>
      %23 = arith.divf %21, %22 : vector<16x1xf32>
      %24 = vector.broadcast %23 : vector<16x1xf32> to vector<16x32xf32>
      %25 = arith.subf %19, %24 : vector<16x32xf32>
      %26 = arith.mulf %25, %25 : vector<16x32xf32>
      %cst_18 = arith.constant dense<0.000000e+00> : vector<16xf32>
      %27 = vector.multi_reduction <add>, %26, %cst_18 [1] : vector<16x32xf32> to vector<16xf32>
      %28 = vector.shape_cast %27 : vector<16xf32> to vector<16x1xf32>
      %cst_19 = arith.constant 3.200000e+01 : f32
      %29 = vector.broadcast %cst_19 : f32 to vector<16x1xf32>
      %30 = arith.divf %28, %29 : vector<16x1xf32>
      %cst_20 = arith.constant 9.99999996E-13 : f32
      %31 = vector.broadcast %cst_20 : f32 to vector<16x1xf32>
      %32 = arith.addf %30, %31 : vector<16x1xf32>
      %33 = math.rsqrt %32 : vector<16x1xf32>
      %34 = vector.broadcast %33 : vector<16x1xf32> to vector<16x32xf32>
      %35 = arith.mulf %25, %34 : vector<16x32xf32>
      %c0_21 = arith.constant 0 : index
      %c0_22 = arith.constant 0 : index
      %36 = vector.load %arg7[%c0_21, %c0_22] : memref<1x32xbf16, #tpu.memory_space<vmem>>, vector<1x32xbf16>
      %37 = arith.extf %36 : vector<1x32xbf16> to vector<1x32xf32>
      %38 = vector.broadcast %37 : vector<1x32xf32> to vector<16x32xf32>
      %39 = arith.mulf %35, %38 : vector<16x32xf32>
      %c0_23 = arith.constant 0 : index
      %c0_24 = arith.constant 0 : index
      %40 = vector.load %arg8[%c0_23, %c0_24] : memref<1x32xbf16, #tpu.memory_space<vmem>>, vector<1x32xbf16>
      %41 = arith.extf %40 : vector<1x32xbf16> to vector<1x32xf32>
      %42 = vector.broadcast %41 : vector<1x32xf32> to vector<16x32xf32>
      %43 = arith.addf %39, %42 : vector<16x32xf32>
      %44 = arith.truncf %43 : vector<16x32xf32> to vector<16x32xbf16>
      %c0_25 = arith.constant 0 : index
      %c0_26 = arith.constant 0 : index
      %45 = vector.load %arg9[%c0_25, %c0_26] : memref<16x32xbf16, #tpu.memory_space<vmem>>, vector<16x32xbf16>
      tpu.vector_store %arg9[%c0_25, %c0_26], %44 {strides = array<i32>} : memref<16x32xbf16, #tpu.memory_space<vmem>>, vector<16x32xbf16>,
    } else {
    }
    return
  }
  func.func @transform_0(%arg0: i32, %arg1: i32, %arg2: i32) -> (i32, i32) {
    %c0_i32 = arith.constant 0 : i32
    return %arg0, %arg2 : i32, i32
  }
  func.func @transform_1(%arg0: i32, %arg1: i32, %arg2: i32) -> (i32, i32) {
    %c0_i32 = arith.constant 0 : i32
    return %arg2, %arg1 : i32, i32
  }
  func.func @transform_2(%arg0: i32, %arg1: i32, %arg2: i32) -> (i32, i32) {
    %c0_i32 = arith.constant 0 : i32
    %c0_i32_0 = arith.constant 0 : i32
    return %c0_i32, %arg1 : i32, i32
  }
  func.func @transform_3(%arg0: i32, %arg1: i32, %arg2: i32) -> (i32, i32) {
    %c0_i32 = arith.constant 0 : i32
    return %arg0, %arg1 : i32, i32
  }
  func.func @transform_4(%arg0: i32, %arg1: i32, %arg2: i32) -> (i32, i32) {
    %c0_i32 = arith.constant 0 : i32
    %c0_i32_0 = arith.constant 0 : i32
    return %c0_i32, %arg1 : i32, i32
  }
  func.func @transform_5(%arg0: i32, %arg1: i32, %arg2: i32) -> (i32, i32) {
    %c0_i32 = arith.constant 0 : i32
    %c0_i32_0 = arith.constant 0 : i32
    return %c0_i32, %arg1 : i32, i32
  }
  func.func @transform_6(%arg0: i32, %arg1: i32, %arg2: i32) -> (i32, i32) {
    %c0_i32 = arith.constant 0 : i32
    return %arg0, %arg1 : i32, i32
  }
}

module attributes {stable_mosaic.version = 11 : i64} {
  func.func @kernel(%arg0: i32, %arg1: i32, %arg2: i32, %arg3: memref<16x32xbf16, #tpu.memory_space<vmem>>, %arg4: memref<32x32xbf16, #tpu.memory_space<vmem>>, %arg5: memref<1x32xbf16, #tpu.memory_space<vmem>>, %arg6: memref<1x32xbf16, #tpu.memory_space<vmem>>, %arg7: memref<1x32xbf16, #tpu.memory_space<vmem>>, %arg8: memref<16x32xbf16, #tpu.memory_space<vmem>>, %arg9: memref<16x32xf32, #tpu.memory_space<vmem>>) attributes {dimension_semantics = [#tpu.dimension_semantics<parallel>, #tpu.dimension_semantics<parallel>, #tpu.dimension_semantics<arbitrary>], iteration_bounds = array<i64: 1, 1, 1>, scalar_prefetch = 0 : i64, scratch_operands = 1 : i64, tpu.core_type = #tpu.core_type<tc>, window_params = [{transform_indices = @transform_0, window_bounds = array<i64: 16, 32>}, {transform_indices = @transform_1, window_bounds = array<i64: 32, 32>}, {transform_indices = @transform_2, window_bounds = array<i64: 1, 32>}, {transform_indices = @transform_3, window_bounds = array<i64: 1, 32>}, {transform_indices = @transform_4, window_bounds = array<i64: 1, 32>}, {transform_indices = @transform_5, window_bounds = array<i64: 16, 32>}]} {
    %c0_i32 = arith.constant 0 : i32
    %0 = arith.cmpi eq, %arg2, %c0_i32 : i32
    %1 = arith.extui %0 : i1 to i32
    %c0_i32_0 = arith.constant 0 : i32
    %2 = arith.cmpi ne, %1, %c0_i32_0 : i32
    scf.if %2 {
      %cst_10 = arith.constant 0.000000e+00 : f32
      %12 = vector.broadcast %cst_10 : f32 to vector<16x32xf32>
      %c0_11 = arith.constant 0 : index
      %c0_12 = arith.constant 0 : index
      %13 = vector.load %arg9[%c0_11, %c0_12] : memref<16x32xf32, #tpu.memory_space<vmem>>, vector<16x32xf32>
      tpu.vector_store %arg9[%c0_11, %c0_12], %12 {strides = array<i32>} : memref<16x32xf32, #tpu.memory_space<vmem>>, vector<16x32xf32>,
    } else {
    }
    %c0 = arith.constant 0 : index
    %c0_1 = arith.constant 0 : index
    %3 = vector.load %arg9[%c0, %c0_1] : memref<16x32xf32, #tpu.memory_space<vmem>>, vector<16x32xf32>
    %c0_2 = arith.constant 0 : index
    %c0_3 = arith.constant 0 : index
    %4 = vector.load %arg3[%c0_2, %c0_3] : memref<16x32xbf16, #tpu.memory_space<vmem>>, vector<16x32xbf16>
    %c0_4 = arith.constant 0 : index
    %c0_5 = arith.constant 0 : index
    %5 = vector.load %arg4[%c0_4, %c0_5] : memref<32x32xbf16, #tpu.memory_space<vmem>>, vector<32x32xbf16>
    %cst = arith.constant dense<0.000000e+00> : vector<16x32xf32>
    %6 = tpu.matmul %4, %5, %cst {dimension_numbers = #tpu.dot_dimension_numbers<[1], [0], [0], [1], [0, 0, 1, 1], [], []>} : vector<16x32xbf16>, vector<32x32xbf16>, vector<16x32xf32> -> vector<16x32xf32>
    %7 = arith.addf %3, %6 : vector<16x32xf32>
    %c0_6 = arith.constant 0 : index
    %c0_7 = arith.constant 0 : index
    %8 = vector.load %arg9[%c0_6, %c0_7] : memref<16x32xf32, #tpu.memory_space<vmem>>, vector<16x32xf32>
    tpu.vector_store %arg9[%c0_6, %c0_7], %7 {strides = array<i32>} : memref<16x32xf32, #tpu.memory_space<vmem>>, vector<16x32xf32>,
    %c0_i32_8 = arith.constant 0 : i32
    %9 = arith.cmpi eq, %arg2, %c0_i32_8 : i32
    %10 = arith.extui %9 : i1 to i32
    %c0_i32_9 = arith.constant 0 : i32
    %11 = arith.cmpi ne, %10, %c0_i32_9 : i32
    scf.if %11 {
      %c0_10 = arith.constant 0 : index
      %c0_11 = arith.constant 0 : index
      %12 = vector.load %arg9[%c0_10, %c0_11] : memref<16x32xf32, #tpu.memory_space<vmem>>, vector<16x32xf32>
      %c0_12 = arith.constant 0 : index
      %c0_13 = arith.constant 0 : index
      %13 = vector.load %arg5[%c0_12, %c0_13] : memref<1x32xbf16, #tpu.memory_space<vmem>>, vector<1x32xbf16>
      %14 = arith.extf %13 : vector<1x32xbf16> to vector<1x32xf32>
      %15 = vector.broadcast %14 : vector<1x32xf32> to vector<16x32xf32>
      %16 = arith.addf %12, %15 : vector<16x32xf32>
      %cst_14 = arith.constant 5.000000e-01 : f32
      %17 = vector.broadcast %cst_14 : f32 to vector<16x32xf32>
      %18 = arith.mulf %17, %16 : vector<16x32xf32>
      %cst_15 = arith.constant 4.471500e-02 : f32
      %19 = vector.broadcast %cst_15 : f32 to vector<16x32xf32>
      %20 = arith.mulf %19, %16 : vector<16x32xf32>
      %21 = arith.mulf %20, %16 : vector<16x32xf32>
      %22 = arith.mulf %21, %16 : vector<16x32xf32>
      %23 = arith.addf %16, %22 : vector<16x32xf32>
      %cst_16 = arith.constant 0.797884583 : f32
      %24 = vector.broadcast %cst_16 : f32 to vector<16x32xf32>
      %25 = arith.mulf %24, %23 : vector<16x32xf32>
      %26 = math.tanh %25 : vector<16x32xf32>
      %cst_17 = arith.constant 1.000000e+00 : f32
      %27 = vector.broadcast %cst_17 : f32 to vector<16x32xf32>
      %28 = arith.addf %27, %26 : vector<16x32xf32>
      %29 = arith.mulf %18, %28 : vector<16x32xf32>
      %cst_18 = arith.constant dense<0.000000e+00> : vector<16xf32>
      %30 = vector.multi_reduction <add>, %29, %cst_18 [1] : vector<16x32xf32> to vector<16xf32>
      %31 = vector.shape_cast %30 : vector<16xf32> to vector<16x1xf32>
      %cst_19 = arith.constant 3.200000e+01 : f32
      %32 = vector.broadcast %cst_19 : f32 to vector<16x1xf32>
      %33 = arith.divf %31, %32 : vector<16x1xf32>
      %34 = vector.broadcast %33 : vector<16x1xf32> to vector<16x32xf32>
      %35 = arith.subf %29, %34 : vector<16x32xf32>
      %36 = arith.mulf %35, %35 : vector<16x32xf32>
      %cst_20 = arith.constant dense<0.000000e+00> : vector<16xf32>
      %37 = vector.multi_reduction <add>, %36, %cst_20 [1] : vector<16x32xf32> to vector<16xf32>
      %38 = vector.shape_cast %37 : vector<16xf32> to vector<16x1xf32>
      %cst_21 = arith.constant 3.200000e+01 : f32
      %39 = vector.broadcast %cst_21 : f32 to vector<16x1xf32>
      %40 = arith.divf %38, %39 : vector<16x1xf32>
      %cst_22 = arith.constant 9.99999996E-13 : f32
      %41 = vector.broadcast %cst_22 : f32 to vector<16x1xf32>
      %42 = arith.addf %40, %41 : vector<16x1xf32>
      %43 = math.rsqrt %42 : vector<16x1xf32>
      %44 = vector.broadcast %43 : vector<16x1xf32> to vector<16x32xf32>
      %45 = arith.mulf %35, %44 : vector<16x32xf32>
      %c0_23 = arith.constant 0 : index
      %c0_24 = arith.constant 0 : index
      %46 = vector.load %arg6[%c0_23, %c0_24] : memref<1x32xbf16, #tpu.memory_space<vmem>>, vector<1x32xbf16>
      %47 = arith.extf %46 : vector<1x32xbf16> to vector<1x32xf32>
      %48 = vector.broadcast %47 : vector<1x32xf32> to vector<16x32xf32>
      %49 = arith.mulf %45, %48 : vector<16x32xf32>
      %c0_25 = arith.constant 0 : index
      %c0_26 = arith.constant 0 : index
      %50 = vector.load %arg7[%c0_25, %c0_26] : memref<1x32xbf16, #tpu.memory_space<vmem>>, vector<1x32xbf16>
      %51 = arith.extf %50 : vector<1x32xbf16> to vector<1x32xf32>
      %52 = vector.broadcast %51 : vector<1x32xf32> to vector<16x32xf32>
      %53 = arith.addf %49, %52 : vector<16x32xf32>
      %54 = arith.truncf %53 : vector<16x32xf32> to vector<16x32xbf16>
      %c0_27 = arith.constant 0 : index
      %c0_28 = arith.constant 0 : index
      %55 = vector.load %arg8[%c0_27, %c0_28] : memref<16x32xbf16, #tpu.memory_space<vmem>>, vector<16x32xbf16>
      tpu.vector_store %arg8[%c0_27, %c0_28], %54 {strides = array<i32>} : memref<16x32xbf16, #tpu.memory_space<vmem>>, vector<16x32xbf16>,
    } else {
    }
    return
  }
  func.func @transform_0(%arg0: i32, %arg1: i32, %arg2: i32) -> (i32, i32) {
    %c0_i32 = arith.constant 0 : i32
    return %arg0, %arg2 : i32, i32
  }
  func.func @transform_1(%arg0: i32, %arg1: i32, %arg2: i32) -> (i32, i32) {
    %c0_i32 = arith.constant 0 : i32
    return %arg2, %arg1 : i32, i32
  }
  func.func @transform_2(%arg0: i32, %arg1: i32, %arg2: i32) -> (i32, i32) {
    %c0_i32 = arith.constant 0 : i32
    %c0_i32_0 = arith.constant 0 : i32
    return %c0_i32, %arg1 : i32, i32
  }
  func.func @transform_3(%arg0: i32, %arg1: i32, %arg2: i32) -> (i32, i32) {
    %c0_i32 = arith.constant 0 : i32
    %c0_i32_0 = arith.constant 0 : i32
    return %c0_i32, %arg1 : i32, i32
  }
  func.func @transform_4(%arg0: i32, %arg1: i32, %arg2: i32) -> (i32, i32) {
    %c0_i32 = arith.constant 0 : i32
    %c0_i32_0 = arith.constant 0 : i32
    return %c0_i32, %arg1 : i32, i32
  }
  func.func @transform_5(%arg0: i32, %arg1: i32, %arg2: i32) -> (i32, i32) {
    %c0_i32 = arith.constant 0 : i32
    return %arg0, %arg1 : i32, i32
  }
}

module attributes {stable_mosaic.version = 11 : i64} {
  func.func @kernel(%arg0: i32, %arg1: i32, %arg2: i32, %arg3: memref<16x32xbf16, #tpu.memory_space<vmem>>, %arg4: memref<128x32xbf16, #tpu.memory_space<vmem>>, %arg5: memref<1x128xbf16, #tpu.memory_space<vmem>>, %arg6: memref<16x128xbf16, #tpu.memory_space<vmem>>, %arg7: memref<16x128xf32, #tpu.memory_space<vmem>>) attributes {dimension_semantics = [#tpu.dimension_semantics<parallel>, #tpu.dimension_semantics<parallel>, #tpu.dimension_semantics<arbitrary>], iteration_bounds = array<i64: 1, 1, 1>, scalar_prefetch = 0 : i64, scratch_operands = 1 : i64, tpu.core_type = #tpu.core_type<tc>, window_params = [{transform_indices = @transform_0, window_bounds = array<i64: 16, 32>}, {transform_indices = @transform_1, window_bounds = array<i64: 128, 32>}, {transform_indices = @transform_2, window_bounds = array<i64: 1, 128>}, {transform_indices = @transform_3, window_bounds = array<i64: 16, 128>}]} {
    %c0_i32 = arith.constant 0 : i32
    %0 = arith.cmpi eq, %arg2, %c0_i32 : i32
    %1 = arith.extui %0 : i1 to i32
    %c0_i32_0 = arith.constant 0 : i32
    %2 = arith.cmpi ne, %1, %c0_i32_0 : i32
    scf.if %2 {
      %cst_10 = arith.constant 0.000000e+00 : f32
      %12 = vector.broadcast %cst_10 : f32 to vector<16x128xf32>
      %c0_11 = arith.constant 0 : index
      %c0_12 = arith.constant 0 : index
      %13 = vector.load %arg7[%c0_11, %c0_12] : memref<16x128xf32, #tpu.memory_space<vmem>>, vector<16x128xf32>
      tpu.vector_store %arg7[%c0_11, %c0_12], %12 {strides = array<i32>} : memref<16x128xf32, #tpu.memory_space<vmem>>, vector<16x128xf32>,
    } else {
    }
    %c0 = arith.constant 0 : index
    %c0_1 = arith.constant 0 : index
    %3 = vector.load %arg7[%c0, %c0_1] : memref<16x128xf32, #tpu.memory_space<vmem>>, vector<16x128xf32>
    %c0_2 = arith.constant 0 : index
    %c0_3 = arith.constant 0 : index
    %4 = vector.load %arg3[%c0_2, %c0_3] : memref<16x32xbf16, #tpu.memory_space<vmem>>, vector<16x32xbf16>
    %c0_4 = arith.constant 0 : index
    %c0_5 = arith.constant 0 : index
    %5 = vector.load %arg4[%c0_4, %c0_5] : memref<128x32xbf16, #tpu.memory_space<vmem>>, vector<128x32xbf16>
    %cst = arith.constant dense<0.000000e+00> : vector<16x128xf32>
    %6 = tpu.matmul %4, %5, %cst {dimension_numbers = #tpu.dot_dimension_numbers<[1], [1], [0], [0], [0, 0, 1, 0], [], []>} : vector<16x32xbf16>, vector<128x32xbf16>, vector<16x128xf32> -> vector<16x128xf32>
    %7 = arith.addf %3, %6 : vector<16x128xf32>
    %c0_6 = arith.constant 0 : index
    %c0_7 = arith.constant 0 : index
    %8 = vector.load %arg7[%c0_6, %c0_7] : memref<16x128xf32, #tpu.memory_space<vmem>>, vector<16x128xf32>
    tpu.vector_store %arg7[%c0_6, %c0_7], %7 {strides = array<i32>} : memref<16x128xf32, #tpu.memory_space<vmem>>, vector<16x128xf32>,
    %c0_i32_8 = arith.constant 0 : i32
    %9 = arith.cmpi eq, %arg2, %c0_i32_8 : i32
    %10 = arith.extui %9 : i1 to i32
    %c0_i32_9 = arith.constant 0 : i32
    %11 = arith.cmpi ne, %10, %c0_i32_9 : i32
    scf.if %11 {
      %c0_10 = arith.constant 0 : index
      %c0_11 = arith.constant 0 : index
      %12 = vector.load %arg7[%c0_10, %c0_11] : memref<16x128xf32, #tpu.memory_space<vmem>>, vector<16x128xf32>
      %c0_12 = arith.constant 0 : index
      %c0_13 = arith.constant 0 : index
      %13 = vector.load %arg5[%c0_12, %c0_13] : memref<1x128xbf16, #tpu.memory_space<vmem>>, vector<1x128xbf16>
      %14 = arith.extf %13 : vector<1x128xbf16> to vector<1x128xf32>
      %15 = vector.broadcast %14 : vector<1x128xf32> to vector<16x128xf32>
      %16 = arith.addf %12, %15 : vector<16x128xf32>
      %17 = arith.truncf %16 : vector<16x128xf32> to vector<16x128xbf16>
      %c0_14 = arith.constant 0 : index
      %c0_15 = arith.constant 0 : index
      %18 = vector.load %arg6[%c0_14, %c0_15] : memref<16x128xbf16, #tpu.memory_space<vmem>>, vector<16x128xbf16>
      tpu.vector_store %arg6[%c0_14, %c0_15], %17 {strides = array<i32>} : memref<16x128xbf16, #tpu.memory_space<vmem>>, vector<16x128xbf16>,
    } else {
    }
    return
  }
  func.func @transform_0(%arg0: i32, %arg1: i32, %arg2: i32) -> (i32, i32) {
    %c0_i32 = arith.constant 0 : i32
    return %arg0, %arg2 : i32, i32
  }
  func.func @transform_1(%arg0: i32, %arg1: i32, %arg2: i32) -> (i32, i32) {
    %c0_i32 = arith.constant 0 : i32
    return %arg1, %arg2 : i32, i32
  }
  func.func @transform_2(%arg0: i32, %arg1: i32, %arg2: i32) -> (i32, i32) {
    %c0_i32 = arith.constant 0 : i32
    %c0_i32_0 = arith.constant 0 : i32
    return %c0_i32, %arg1 : i32, i32
  }
  func.func @transform_3(%arg0: i32, %arg1: i32, %arg2: i32) -> (i32, i32) {
    %c0_i32 = arith.constant 0 : i32
    return %arg0, %arg1 : i32, i32
  }
}

module attributes {stable_mosaic.version = 11 : i64} {
  func.func @kernel(%arg0: i32, %arg1: i32, %arg2: i32, %arg3: memref<2x32xbf16, #tpu.memory_space<vmem>>, %arg4: memref<32x256xbf16, #tpu.memory_space<vmem>>, %arg5: memref<1x256xbf16, #tpu.memory_space<vmem>>, %arg6: memref<2x256xbf16, #tpu.memory_space<vmem>>, %arg7: memref<2x256xf32, #tpu.memory_space<vmem>>) attributes {dimension_semantics = [#tpu.dimension_semantics<parallel>, #tpu.dimension_semantics<parallel>, #tpu.dimension_semantics<arbitrary>], iteration_bounds = array<i64: 1, 1, 1>, scalar_prefetch = 0 : i64, scratch_operands = 1 : i64, tpu.core_type = #tpu.core_type<tc>, window_params = [{transform_indices = @transform_0, window_bounds = array<i64: 2, 32>}, {transform_indices = @transform_1, window_bounds = array<i64: 32, 256>}, {transform_indices = @transform_2, window_bounds = array<i64: 1, 256>}, {transform_indices = @transform_3, window_bounds = array<i64: 2, 256>}]} {
    %c0_i32 = arith.constant 0 : i32
    %0 = arith.cmpi eq, %arg2, %c0_i32 : i32
    %1 = arith.extui %0 : i1 to i32
    %c0_i32_0 = arith.constant 0 : i32
    %2 = arith.cmpi ne, %1, %c0_i32_0 : i32
    scf.if %2 {
      %cst_10 = arith.constant 0.000000e+00 : f32
      %12 = vector.broadcast %cst_10 : f32 to vector<2x256xf32>
      %c0_11 = arith.constant 0 : index
      %c0_12 = arith.constant 0 : index
      %13 = vector.load %arg7[%c0_11, %c0_12] : memref<2x256xf32, #tpu.memory_space<vmem>>, vector<2x256xf32>
      tpu.vector_store %arg7[%c0_11, %c0_12], %12 {strides = array<i32>} : memref<2x256xf32, #tpu.memory_space<vmem>>, vector<2x256xf32>,
    } else {
    }
    %c0 = arith.constant 0 : index
    %c0_1 = arith.constant 0 : index
    %3 = vector.load %arg7[%c0, %c0_1] : memref<2x256xf32, #tpu.memory_space<vmem>>, vector<2x256xf32>
    %c0_2 = arith.constant 0 : index
    %c0_3 = arith.constant 0 : index
    %4 = vector.load %arg3[%c0_2, %c0_3] : memref<2x32xbf16, #tpu.memory_space<vmem>>, vector<2x32xbf16>
    %c0_4 = arith.constant 0 : index
    %c0_5 = arith.constant 0 : index
    %5 = vector.load %arg4[%c0_4, %c0_5] : memref<32x256xbf16, #tpu.memory_space<vmem>>, vector<32x256xbf16>
    %cst = arith.constant dense<0.000000e+00> : vector<2x256xf32>
    %6 = tpu.matmul %4, %5, %cst {dimension_numbers = #tpu.dot_dimension_numbers<[1], [0], [0], [1], [0, 0, 1, 1], [], []>} : vector<2x32xbf16>, vector<32x256xbf16>, vector<2x256xf32> -> vector<2x256xf32>
    %7 = arith.addf %3, %6 : vector<2x256xf32>
    %c0_6 = arith.constant 0 : index
    %c0_7 = arith.constant 0 : index
    %8 = vector.load %arg7[%c0_6, %c0_7] : memref<2x256xf32, #tpu.memory_space<vmem>>, vector<2x256xf32>
    tpu.vector_store %arg7[%c0_6, %c0_7], %7 {strides = array<i32>} : memref<2x256xf32, #tpu.memory_space<vmem>>, vector<2x256xf32>,
    %c0_i32_8 = arith.constant 0 : i32
    %9 = arith.cmpi eq, %arg2, %c0_i32_8 : i32
    %10 = arith.extui %9 : i1 to i32
    %c0_i32_9 = arith.constant 0 : i32
    %11 = arith.cmpi ne, %10, %c0_i32_9 : i32
    scf.if %11 {
      %c0_10 = arith.constant 0 : index
      %c0_11 = arith.constant 0 : index
      %12 = vector.load %arg7[%c0_10, %c0_11] : memref<2x256xf32, #tpu.memory_space<vmem>>, vector<2x256xf32>
      %c0_12 = arith.constant 0 : index
      %c0_13 = arith.constant 0 : index
      %13 = vector.load %arg5[%c0_12, %c0_13] : memref<1x256xbf16, #tpu.memory_space<vmem>>, vector<1x256xbf16>
      %14 = arith.extf %13 : vector<1x256xbf16> to vector<1x256xf32>
      %15 = vector.broadcast %14 : vector<1x256xf32> to vector<2x256xf32>
      %16 = arith.addf %12, %15 : vector<2x256xf32>
      %17 = math.tanh %16 : vector<2x256xf32>
      %18 = arith.truncf %17 : vector<2x256xf32> to vector<2x256xbf16>
      %c0_14 = arith.constant 0 : index
      %c0_15 = arith.constant 0 : index
      %19 = vector.load %arg6[%c0_14, %c0_15] : memref<2x256xbf16, #tpu.memory_space<vmem>>, vector<2x256xbf16>
      tpu.vector_store %arg6[%c0_14, %c0_15], %18 {strides = array<i32>} : memref<2x256xbf16, #tpu.memory_space<vmem>>, vector<2x256xbf16>,
    } else {
    }
    return
  }
  func.func @transform_0(%arg0: i32, %arg1: i32, %arg2: i32) -> (i32, i32) {
    %c0_i32 = arith.constant 0 : i32
    return %arg0, %arg2 : i32, i32
  }
  func.func @transform_1(%arg0: i32, %arg1: i32, %arg2: i32) -> (i32, i32) {
    %c0_i32 = arith.constant 0 : i32
    return %arg2, %arg1 : i32, i32
  }
  func.func @transform_2(%arg0: i32, %arg1: i32, %arg2: i32) -> (i32, i32) {
    %c0_i32 = arith.constant 0 : i32
    %c0_i32_0 = arith.constant 0 : i32
    return %c0_i32, %arg1 : i32, i32
  }
  func.func @transform_3(%arg0: i32, %arg1: i32, %arg2: i32) -> (i32, i32) {
    %c0_i32 = arith.constant 0 : i32
    return %arg0, %arg1 : i32, i32
  }
}

module attributes {stable_mosaic.version = 11 : i64} {
  func.func @kernel(%arg0: i32, %arg1: i32, %arg2: i32, %arg3: memref<2x32xbf16, #tpu.memory_space<vmem>>, %arg4: memref<32x256xbf16, #tpu.memory_space<vmem>>, %arg5: memref<1x256xbf16, #tpu.memory_space<vmem>>, %arg6: memref<2x256xbf16, #tpu.memory_space<vmem>>, %arg7: memref<2x256xf32, #tpu.memory_space<vmem>>) attributes {dimension_semantics = [#tpu.dimension_semantics<parallel>, #tpu.dimension_semantics<parallel>, #tpu.dimension_semantics<arbitrary>], iteration_bounds = array<i64: 1, 1, 1>, scalar_prefetch = 0 : i64, scratch_operands = 1 : i64, tpu.core_type = #tpu.core_type<tc>, window_params = [{transform_indices = @transform_0, window_bounds = array<i64: 2, 32>}, {transform_indices = @transform_1, window_bounds = array<i64: 32, 256>}, {transform_indices = @transform_2, window_bounds = array<i64: 1, 256>}, {transform_indices = @transform_3, window_bounds = array<i64: 2, 256>}]} {
    %c0_i32 = arith.constant 0 : i32
    %0 = arith.cmpi eq, %arg2, %c0_i32 : i32
    %1 = arith.extui %0 : i1 to i32
    %c0_i32_0 = arith.constant 0 : i32
    %2 = arith.cmpi ne, %1, %c0_i32_0 : i32
    scf.if %2 {
      %cst_10 = arith.constant 0.000000e+00 : f32
      %12 = vector.broadcast %cst_10 : f32 to vector<2x256xf32>
      %c0_11 = arith.constant 0 : index
      %c0_12 = arith.constant 0 : index
      %13 = vector.load %arg7[%c0_11, %c0_12] : memref<2x256xf32, #tpu.memory_space<vmem>>, vector<2x256xf32>
      tpu.vector_store %arg7[%c0_11, %c0_12], %12 {strides = array<i32>} : memref<2x256xf32, #tpu.memory_space<vmem>>, vector<2x256xf32>,
    } else {
    }
    %c0 = arith.constant 0 : index
    %c0_1 = arith.constant 0 : index
    %3 = vector.load %arg7[%c0, %c0_1] : memref<2x256xf32, #tpu.memory_space<vmem>>, vector<2x256xf32>
    %c0_2 = arith.constant 0 : index
    %c0_3 = arith.constant 0 : index
    %4 = vector.load %arg3[%c0_2, %c0_3] : memref<2x32xbf16, #tpu.memory_space<vmem>>, vector<2x32xbf16>
    %c0_4 = arith.constant 0 : index
    %c0_5 = arith.constant 0 : index
    %5 = vector.load %arg4[%c0_4, %c0_5] : memref<32x256xbf16, #tpu.memory_space<vmem>>, vector<32x256xbf16>
    %cst = arith.constant dense<0.000000e+00> : vector<2x256xf32>
    %6 = tpu.matmul %4, %5, %cst {dimension_numbers = #tpu.dot_dimension_numbers<[1], [0], [0], [1], [0, 0, 1, 1], [], []>} : vector<2x32xbf16>, vector<32x256xbf16>, vector<2x256xf32> -> vector<2x256xf32>
    %7 = arith.addf %3, %6 : vector<2x256xf32>
    %c0_6 = arith.constant 0 : index
    %c0_7 = arith.constant 0 : index
    %8 = vector.load %arg7[%c0_6, %c0_7] : memref<2x256xf32, #tpu.memory_space<vmem>>, vector<2x256xf32>
    tpu.vector_store %arg7[%c0_6, %c0_7], %7 {strides = array<i32>} : memref<2x256xf32, #tpu.memory_space<vmem>>, vector<2x256xf32>,
    %c0_i32_8 = arith.constant 0 : i32
    %9 = arith.cmpi eq, %arg2, %c0_i32_8 : i32
    %10 = arith.extui %9 : i1 to i32
    %c0_i32_9 = arith.constant 0 : i32
    %11 = arith.cmpi ne, %10, %c0_i32_9 : i32
    scf.if %11 {
      %c0_10 = arith.constant 0 : index
      %c0_11 = arith.constant 0 : index
      %12 = vector.load %arg7[%c0_10, %c0_11] : memref<2x256xf32, #tpu.memory_space<vmem>>, vector<2x256xf32>
      %c0_12 = arith.constant 0 : index
      %c0_13 = arith.constant 0 : index
      %13 = vector.load %arg5[%c0_12, %c0_13] : memref<1x256xbf16, #tpu.memory_space<vmem>>, vector<1x256xbf16>
      %14 = arith.extf %13 : vector<1x256xbf16> to vector<1x256xf32>
      %15 = vector.broadcast %14 : vector<1x256xf32> to vector<2x256xf32>
      %16 = arith.addf %12, %15 : vector<2x256xf32>
      %17 = arith.truncf %16 : vector<2x256xf32> to vector<2x256xbf16>
      %c0_14 = arith.constant 0 : index
      %c0_15 = arith.constant 0 : index
      %18 = vector.load %arg6[%c0_14, %c0_15] : memref<2x256xbf16, #tpu.memory_space<vmem>>, vector<2x256xbf16>
      tpu.vector_store %arg6[%c0_14, %c0_15], %17 {strides = array<i32>} : memref<2x256xbf16, #tpu.memory_space<vmem>>, vector<2x256xbf16>,
    } else {
    }
    return
  }
  func.func @transform_0(%arg0: i32, %arg1: i32, %arg2: i32) -> (i32, i32) {
    %c0_i32 = arith.constant 0 : i32
    return %arg0, %arg2 : i32, i32
  }
  func.func @transform_1(%arg0: i32, %arg1: i32, %arg2: i32) -> (i32, i32) {
    %c0_i32 = arith.constant 0 : i32
    return %arg2, %arg1 : i32, i32
  }
  func.func @transform_2(%arg0: i32, %arg1: i32, %arg2: i32) -> (i32, i32) {
    %c0_i32 = arith.constant 0 : i32
    %c0_i32_0 = arith.constant 0 : i32
    return %c0_i32, %arg1 : i32, i32
  }
  func.func @transform_3(%arg0: i32, %arg1: i32, %arg2: i32) -> (i32, i32) {
    %c0_i32 = arith.constant 0 : i32
    return %arg0, %arg1 : i32, i32
  }
}

</mosaic_0001>

<bundles_post_ra>
// kernel: bert_forward.16
= control target key start
LH: loop header
LB: loop body
LE: loop exit
PB: predicated region body
PF: predicated region fallthrough
CT: control target
= control target key end

     0   :  { %vm58_vm0 = vcmask 261120   ;;  %s209_s1 = inlined_call_operand.vmem [shape: bf16[32,256], index: 1, kind: input, shape index: {}]   ;;  %s210_s0 = inlined_call_operand.vmem [shape: bf16[16,32], index: 0, kind: input, shape index: {}]   ;;  %s211_s2 = inlined_call_operand.vmem [shape: bf16[1,256], index: 2, kind: input, shape index: {}]   ;;  %s212_s3 = inlined_call_operand.vmem [shape: bf16[16,256], index: 3, kind: output, shape index: {}]  }
   0x1   :  { %v140_v0 = vld [vmem:[%s209_s1 + $0x10] sm:$0xf]  ;;  %v152_v1 = vld [vmem:[%s209_s1 + $0x14] sm:$0xf0]  ;;  %v151_v2 = vld [vmem:[%s209_s1 + $0x14] sm:$0xf] }
   0x2   :  { %v141_v3 = vor.u32 %v152_v1, %v140_v0  ;;  %v142_v4 = vld [vmem:[%s209_s1 + $0x18] sm:$0xf0]  ;;  %v132_v5 = vld [vmem:[%s209_s1] sm:$0xf]  ;;  %v150_v6 = vld [vmem:[%s209_s1 + $0x4] sm:$0xf0] }
   0x3   :  { %v145_v7 = vor.u32 %v151_v2, %v142_v4  ;;  %v149_v8 = vld [vmem:[%s209_s1 + $0x4] sm:$0xf]  ;;  %v134_v9 = vld [vmem:[%s209_s1 + $0x8] sm:$0xf0]  ;;  %v133_v10 = vor.u32 %v150_v6, %v132_v5  ;;  %v105_v13 = vld [vmem:[%s211_s2] sm:$0x3] }
   0x4   :  { %68 = vmatpush.bf16.msra.mxu0 %v141_v3  ;;  %v137_v11 = vor.u32 %v149_v8, %v134_v9  ;;  %v148_v12 = vld [vmem:[%s210_s0] sm:$0xff]  ;;  %v106_v14 = vunpack.c.l.bf16 %v105_v13 }
   0x5   :  { %82 = vmatpush.bf16.msra.mxu1 %v145_v7 }
   0x6   :  { %v108_v15 = vperm.slane %v106_v14, 0  ;;  %v109_v16 = vperm.slane %v106_v14, 2 }
   0x8   :  { %69 = vmatpush.bf16.msra.mxu0 %v133_v10  ;;  %v112_v17 = vperm.slane %v108_v15, 0  ;;  %v113_v18 = vperm.slane %v109_v16, 0 }
   0x9   :  { %83 = vmatpush.bf16.msra.mxu1 %v137_v11 }
   0xb   :  { %146 = vmatmul.msk.bf16.vlgmr.msra.gmra.mxu0 %vm58_vm0, %v148_v12 }
   0xc   :  { %147 = vmatmul.msk.bf16.vlgmr.msra.gmra.mxu1 %vm58_vm0, %v148_v12 }
  0x88   :  { %v71_v19 = vpop.f32.mrf.mxu0 }
  0x89   :  { %v114_v20 = vadd.f32 %v112_v17, %v71_v19  ;;  %v85_v21 = vpop.f32.mrf.mxu1 }
  0x8a   :  { %v115_v22 = vadd.f32 %v113_v18, %v85_v21 }
  0x8c   :  { %v118_v23 = vpack.c.bf16 %v115_v22, %v114_v20 }
  0x8e   :  { %120 = vst [vmem:[%s212_s3] sm:$0xff] %v118_v23 }
  0x90   :  { %v73_v24 = vpop.f32.mrf.mxu0 }
  0x91   :  { %v116_v25 = vadd.f32 %v112_v17, %v73_v24  ;;  %v87_v26 = vpop.f32.mrf.mxu1 }
  0x92   :  { %v117_v27 = vadd.f32 %v113_v18, %v87_v26 }
  0x94   :  { %v119_v28 = vpack.c.bf16 %v117_v27, %v116_v25 }
  0x96   :  { %121 = vst [vmem:[%s212_s3 + $0x8] sm:$0xff] %v119_v28 }

// kernel: bert_forward.15
= control target key start
LH: loop header
LB: loop body
LE: loop exit
PB: predicated region body
PF: predicated region fallthrough
CT: control target
= control target key end

     0   :  { %s521_s18 = smov 0   ;;  %s523_s19 = smov 0   ;;  %s573_s0 = inlined_call_operand.vmem [shape: bf16[16,32], index: 0, kind: input, shape index: {}]   ;;  %s574_s1 = inlined_call_operand.vmem [shape: bf16[16,32], index: 1, kind: input, shape index: {}]   ;;  %s575_s2 = inlined_call_operand.vmem [shape: bf16[64,32], index: 2, kind: input, shape index: {}]   ;;  %s576_s3 = inlined_call_operand.vmem [shape: bf16[1,32], index: 3, kind: input, shape index: {}]   ;;  %s577_s4 = inlined_call_operand.vmem [shape: bf16[1,32], index: 4, kind: input, shape index: {}]   ;;  %s578_s5 = inlined_call_operand.vmem [shape: bf16[16,32], index: 5, kind: output, shape index: {}]  }
   0x1   :  { %s525_s20 = smov 0  }
   0x2 LB: > { %s27_s21 = sadd.s32 1, %s484_s19  ;;  %p431_p0 = scmp.ge.s32.totalorder %s488_s20, 1  ;;  %s488_s20 = sphi %s525_s20, %s15_s20   ;;  %s484_s19 = sphi %s523_s19, %s580_s19   ;;  %s480_s18 = sphi %s521_s18, %s579_s18  }
   0x3   : > { %p29_p1 = scmp.ge.s32.totalorder %s27_s21, 2  ;;  %p226_p2 = scmp.lt.s32.totalorder %s488_s20, 3 }
   0x5   : > { %s582_s21 = smov (%p29_p1, %s27_s21), 0  ;;  %p227_p3 = pnand %p431_p0, %p226_p2 }
   0x6   : > { %p264_p4 = scmp.lt.s32.totalorder (!%p227_p3), %s480_s18, 1 }
   0x7   : > { %230 = sbr.rel (%p227_p3) target bundleno = 294 (0x126), region = 40 }
   0xc   : > { %s584_s18 = smov (!%p264_p4, %s480_s18), 1  ;;  %v290_v0 = vld [vmem:[%s575_s2] sm:$0xf]  ;;  %vm293_vm0 = vcmask 261120   ;;  %v490_v9 = vmov 32.0   ;;  %vm332_vm5 = vcmask 257024  }
   0xd   : > { %s539_s22 = sshll.u32 %s584_s18, 2  ;;  %v291_v5 = vunpack.c.l.bf16 %v290_v0  ;;  %462 = vrcp.f32 %v490_v9  ;;  %v323_v26 = vld [vmem:[%s576_s3] sm:$0x1] }
   0xe   : > { %s267_s27 = scalar_lea.vmem %s573_s0, %s539_s22  ;;  %s273_s30 = scalar_lea.vmem %s574_s1, %s539_s22  ;;  %v327_v28 = vld [vmem:[%s577_s4] sm:$0x1]  ;;  %v324_v30 = vunpack.c.l.bf16 %v323_v26 }
   0xf   : > { %v285_v1 = vld [vmem:[%s267_s27] sm:$0xf]  ;;  %v328_v32 = vunpack.c.l.bf16 %v327_v28  ;;  %s283_s12 = scalar_lea.vmem %s578_s5, %s539_s22 }
  0x10   : > { %v287_v2 = vld [vmem:[%s273_s30] sm:$0xf]  ;;  %v286_v3 = vunpack.c.l.bf16 %v285_v1  ;;  %v325_v34 = vperm.slane %v324_v30, 0 }
  0x11   : > { %v288_v4 = vunpack.c.l.bf16 %v287_v2  ;;  %v329_v36 = vperm.slane %v328_v32, 0 }
  0x13   : > { %v289_v6 = vadd.f32 %v288_v4, %v286_v3  ;;  %v463_v10 = vpop.eup %462 }
  0x14   : > { %v298_v11 = vmul.f32 32.0, %v463_v10  ;;  %vm302_vm1 = vweird.f32 %v463_v10 }
  0x15   : > { %v292_v7 = vadd.f32 %v291_v5, %v289_v6 }
  0x16   : > { %v299_v12 = vsub.f32 1.0, %v298_v11 }
  0x17   : > { %v294_v8 = vsel %vm293_vm0, %v292_v7, 0.0 }
  0x18   : > { %295 = vadd.xlane.f32.xlu0 %v294_v8  ;;  %v300_v13 = vmul.f32 %v463_v10, %v299_v12 }
  0x1a   : > { %v301_v14 = vadd.f32 %v463_v10, %v300_v13 }
  0x1c   : > { %v303_v15 = vsel %vm302_vm1, %v463_v10, %v301_v14 }
  0x8b   : > { %v296_v16 = vpop.xlane.xlu0 %295 }
  0x8c   : > { %v304_v17 = vmul.f32 %v303_v15, %v296_v16 }
  0x8e   : > { %v305_v18 = vsub.f32 %v292_v7, %v304_v17 }
  0x90   : > { %v306_v19 = vmul.f32 %v305_v18, %v305_v18 }
  0x92   : > { %v307_v20 = vsel %vm293_vm0, %v306_v19, 0.0 }
  0x93   : > { %308 = vadd.xlane.f32.xlu0 %v307_v20 }
 0x106   : > { %v309_v21 = vpop.xlane.xlu0 %308 }
 0x107   : > { %v310_v22 = vmul.f32 %v309_v21, %v303_v15 }
 0x109   : > { %v311_v23 = vadd.f32 1e-12, %v310_v22 }
 0x10b   : > { %464 = vrsqrt.f32 %v311_v23  ;;  %vm318_vm3 = vweird.f32 %v311_v23 }
 0x111   : > { %v465_v24 = vpop.eup %464 }
 0x112   : > { %v313_v25 = vmul.f32 %v465_v24, %v311_v23  ;;  %vm319_vm2 = vweird.f32 %v465_v24 }
 0x113   : > { %vm320_vm4 = vmor %vm318_vm3, %vm319_vm2 }
 0x114   : > { %v314_v27 = vmul.f32 %v465_v24, %v313_v25 }
 0x116   : > { %v315_v29 = vmul.f32 0.5, %v314_v27 }
 0x118   : > { %v316_v31 = vsub.f32 1.5, %v315_v29 }
 0x11a   : > { %v317_v33 = vmul.f32 %v465_v24, %v316_v31 }
 0x11c   : > { %v321_v35 = vsel %vm320_vm4, %v465_v24, %v317_v33 }
 0x11d   : > { %v322_v37 = vmul.f32 %v321_v35, %v305_v18 }
 0x11f   : > { %v326_v38 = vmul.f32 %v325_v34, %v322_v37 }
 0x121   : > { %v330_v39 = vadd.f32 %v329_v36, %v326_v38 }
 0x123   : > { %v331_v40 = vpack.c.bf16 %v330_v39, %v330_v39 }
 0x125   : > { %333 = vst.msk [vmem:[%s283_s12] sm:$0xf] %vm332_vm5, %v331_v40 }
 0x126 PF: > { %s15_s20 = sadd.s32 1, %s488_s20   ;;  %s579_s18 = smov %s484_s19 }
 0x127   : > { %p12_p5 = scmp.ge.s32.totalorder %s15_s20, 4   ;;  %s580_s19 = smov %s582_s21 }
 0x129   :  { %14 = sbr.rel (!%p12_p5) target bundleno = 2 (0x2), region = 76 }

// kernel: bert_forward.18
= control target key start
LH: loop header
LB: loop body
LE: loop exit
PB: predicated region body
PF: predicated region fallthrough
CT: control target
= control target key end

     0   :  { %vm28_vm0 = vcmask 261120   ;;  %v192_v1 = vmov 0.0   ;;  %v193_v24 = vmov 32.0   ;;  %vm157_vm6 = vcmask 257024   ;;  %s265_s1 = inlined_call_operand.vmem [shape: bf16[32,32], index: 1, kind: input, shape index: {}]   ;;  %s266_s0 = inlined_call_operand.vmem [shape: bf16[16,32], index: 0, kind: input, shape index: {}]   ;;  %s267_s2 = inlined_call_operand.vmem [shape: bf16[1,32], index: 2, kind: input, shape index: {}]   ;;  %s268_s3 = inlined_call_operand.vmem [shape: bf16[16,32], index: 3, kind: input, shape index: {}]   ;;  %s269_s4 = inlined_call_operand.vmem [shape: bf16[1,32], index: 4, kind: input, shape index: {}]   ;;  %s270_s5 = inlined_call_operand.vmem [shape: bf16[1,32], index: 5, kind: input, shape index: {}]   ;;  %s271_s6 = inlined_call_operand.vmem [shape: bf16[16,32], index: 6, kind: output, shape index: {}]  }
   0x1   :  { %v179_v0 = vld [vmem:[%s265_s1 + $0x8] sm:$0xff]  ;;  %29 = vst.msk [vmem:[#allocation2] sm:$0xff] %vm28_vm0, %v192_v1  ;;  %v178_v2 = vld [vmem:[%s265_s1] sm:$0xff]  ;;  %186 = vrcp.f32 %v193_v24 }
   0x2   :  { %30 = vst.msk [vmem:[#allocation2 + $0x8] sm:$0xff] %vm28_vm0, %v192_v1  ;;  %66 = vmatpush.bf16.msra.mxu0 %v179_v0  ;;  %v177_v3 = vld [vmem:[%s266_s0] sm:$0xff] }
   0x3   :  { %v83_v6 = vld [vmem:[%s267_s2] sm:$0x1] }
   0x4   :  { %v84_v8 = vunpack.c.l.bf16 %v83_v6  ;;  %v181_v10 = vld [vmem:[%s268_s3] sm:$0xff]  }
   0x5   :  { %v182_v14 = vunpack.c.l.bf16 %v181_v10  ;;  %v183_v19 = vunpack.c.h.bf16 %v181_v10  ;;  %v145_v49 = vld [vmem:[%s269_s4] sm:$0x1] }
   0x6   :  { %67 = vmatpush.bf16.msra.mxu0 %v178_v2  ;;  %v85_v11 = vperm.slane %v84_v8, 0  ;;  %v150_v51 = vld [vmem:[%s270_s5] sm:$0x1]  ;;  %v146_v53 = vunpack.c.l.bf16 %v145_v49 }
   0x7   :  { %v187_v25 = vpop.eup %186  ;;  %v151_v56 = vunpack.c.l.bf16 %v150_v51 }
   0x8   :  { %v31_v4 = vld [vmem:[#allocation2] sm:$0xff]  ;;  %v101_v26 = vmul.f32 32.0, %v187_v25  ;;  %vm105_vm1 = vweird.f32 %v187_v25  ;;  %v147_v59 = vperm.slane %v146_v53, 0 }
   0x9   :  { %176 = vmatmul.msk.bf16.vlgmr.msra.gmra.mxu0 %vm28_vm0, %v177_v3  ;;  %v32_v9 = vld [vmem:[#allocation2 + $0x8] sm:$0xff]  ;;  %v152_v62 = vperm.slane %v151_v56, 0 }
   0xa   :  { %v102_v27 = vsub.f32 1.0, %v101_v26 }
   0xc   :  { %v103_v28 = vmul.f32 %v187_v25, %v102_v27 }
   0xe   :  { %v104_v29 = vadd.f32 %v187_v25, %v103_v28 }
  0x10   :  { %v106_v30 = vsel %vm105_vm1, %v187_v25, %v104_v29 }
  0x86   :  { %v69_v5 = vpop.f32.mrf.mxu0 }
  0x87   :  { %v74_v7 = vadd.f32 %v69_v5, %v31_v4 }
  0x89   :  { %76 = vst.msk [vmem:[#allocation2] sm:$0xff] %vm28_vm0, %v74_v7 }
  0x8e   :  { %v71_v12 = vpop.f32.mrf.mxu0 }
  0x8f   :  { %v75_v13 = vadd.f32 %v71_v12, %v32_v9 }
  0x90   :  { %v81_v15 = vld [vmem:[#allocation2] sm:$0xff] }
  0x91   :  { %77 = vst.msk [vmem:[#allocation2 + $0x8] sm:$0xff] %vm28_vm0, %v75_v13  ;;  %v86_v16 = vadd.f32 %v85_v11, %v81_v15 }
  0x93   :  { %v92_v17 = vadd.f32 %v182_v14, %v86_v16 }
  0x95   :  { %v94_v18 = vsel %vm28_vm0, %v92_v17, 0.0 }
  0x96   :  { %95 = vadd.xlane.f32.xlu0 %v94_v18 }
  0x98   :  { %v82_v20 = vld [vmem:[#allocation2 + $0x8] sm:$0xff] }
  0x99   :  { %v87_v21 = vadd.f32 %v85_v11, %v82_v20 }
  0x9b   :  { %v93_v22 = vadd.f32 %v183_v19, %v87_v21 }
  0x9d   :  { %v97_v23 = vsel %vm28_vm0, %v93_v22, 0.0 }
  0x9e   :  { %98 = vadd.xlane.f32.xlu0 %v97_v23 }
 0x109   :  { %v96_v31 = vpop.xlane.xlu0 %95 }
 0x10a   :  { %v107_v32 = vmul.f32 %v106_v30, %v96_v31 }
 0x10c   :  { %v109_v33 = vsub.f32 %v92_v17, %v107_v32 }
 0x10e   :  { %v111_v34 = vmul.f32 %v109_v33, %v109_v33 }
 0x110   :  { %v113_v35 = vsel %vm28_vm0, %v111_v34, 0.0 }
 0x111   :  { %114 = vadd.xlane.f32.xlu1 %v113_v35  ;;  %v99_v36 = vpop.xlane.xlu0 %98 }
 0x112   :  { %v108_v37 = vmul.f32 %v106_v30, %v99_v36 }
 0x114   :  { %v110_v38 = vsub.f32 %v93_v22, %v108_v37 }
 0x116   :  { %v112_v39 = vmul.f32 %v110_v38, %v110_v38 }
 0x118   :  { %v116_v40 = vsel %vm28_vm0, %v112_v39, 0.0 }
 0x119   :  { %117 = vadd.xlane.f32.xlu1 %v116_v40 }
 0x184   :  { %v115_v41 = vpop.xlane.xlu1 %114 }
 0x185   :  { %v119_v42 = vmul.f32 %v115_v41, %v106_v30 }
 0x187   :  { %v121_v43 = vadd.f32 1e-12, %v119_v42 }
 0x189   :  { %188 = vrsqrt.f32 %v121_v43  ;;  %vm129_vm3 = vweird.f32 %v121_v43 }
 0x18c   :  { %v118_v44 = vpop.xlane.xlu1 %117 }
 0x18d   :  { %v120_v45 = vmul.f32 %v118_v44, %v106_v30 }
 0x18f   :  { %v189_v46 = vpop.eup %188  ;;  %v122_v47 = vadd.f32 1e-12, %v120_v45 }
 0x190   :  { %v124_v48 = vmul.f32 %v189_v46, %v121_v43  ;;  %vm130_vm2 = vweird.f32 %v189_v46 }
 0x191   :  { %190 = vrsqrt.f32 %v122_v47  ;;  %vm131_vm4 = vmor %vm129_vm3, %vm130_vm2  ;;  %vm139_vm7 = vweird.f32 %v122_v47 }
 0x192   :  { %v125_v50 = vmul.f32 %v189_v46, %v124_v48 }
 0x194   :  { %v126_v52 = vmul.f32 0.5, %v125_v50 }
 0x196   :  { %v127_v54 = vsub.f32 1.5, %v126_v52 }
 0x197   :  { %v191_v55 = vpop.eup %190 }
 0x198   :  { %v128_v57 = vmul.f32 %v189_v46, %v127_v54  ;;  %v134_v58 = vmul.f32 %v191_v55, %v122_v47  ;;  %vm140_vm5 = vweird.f32 %v191_v55 }
 0x199   :  { %vm141_vm8 = vmor %vm139_vm7, %vm140_vm5 }
 0x19a   :  { %v132_v60 = vsel %vm131_vm4, %v189_v46, %v128_v57  ;;  %v135_v61 = vmul.f32 %v191_v55, %v134_v58 }
 0x19b   :  { %v143_v63 = vmul.f32 %v132_v60, %v109_v33 }
 0x19c   :  { %v136_v0 = vmul.f32 0.5, %v135_v61 }
 0x19d   :  { %v148_v1 = vmul.f32 %v147_v59, %v143_v63 }
 0x19e   :  { %v137_v2 = vsub.f32 1.5, %v136_v0 }
 0x19f   :  { %v153_v3 = vadd.f32 %v152_v62, %v148_v1 }
 0x1a0   :  { %v138_v4 = vmul.f32 %v191_v55, %v137_v2 }
 0x1a1   :  { %v155_v5 = vpack.c.bf16 %v153_v3, %v153_v3 }
 0x1a2   :  { %v142_v6 = vsel %vm141_vm8, %v191_v55, %v138_v4 }
 0x1a3   :  { %158 = vst.msk [vmem:[%s271_s6] sm:$0xf] %vm157_vm6, %v155_v5  ;;  %v144_v7 = vmul.f32 %v142_v6, %v110_v38 }
 0x1a5   :  { %v149_v8 = vmul.f32 %v147_v59, %v144_v7 }
 0x1a7   :  { %v154_v9 = vadd.f32 %v152_v62, %v149_v8 }
 0x1a9   :  { %v156_v10 = vpack.c.bf16 %v154_v9, %v154_v9 }
 0x1ab   :  { %159 = vst.msk [vmem:[%s271_s6 + $0x4] sm:$0xf] %vm157_vm6, %v156_v10 }

// kernel: bert_forward.17
= control target key start
LH: loop header
LB: loop body
LE: loop exit
PB: predicated region body
PF: predicated region fallthrough
CT: control target
= control target key end

     0   :  { %s565_s9 = smov 0   ;;  %s636_s0 = inlined_call_operand.vmem [shape: bf16[2,8,96], index: 0, kind: input, shape index: {}]   ;;  %s637_s1 = inlined_call_operand.vmem [shape: f32[2,1,8], index: 1, kind: input, shape index: {}]   ;;  %s638_s2 = inlined_call_operand.vmem [shape: bf16[2,8,32], index: 2, kind: output, shape index: {}]  }
   0x1 LB: > { %s472_s10 = sadd.s32 4294967295, %s534_s9   ;;  %p476_p0 = scmp.ge.s32.totalorder %s534_s9, 1  ;;  %s534_s9 = sphi %s565_s9, %s12_s9  }
   0x2   : > { %p119_p1 = scmp.lt.s32.totalorder %s534_s9, 3 }
   0x4   : > { %p120_p2 = pnand %p476_p0, %p119_p1 }
   0x5   : > { %p142_p3 = scmp.lt.s32.totalorder (!%p120_p2), %s472_s10, 1  ;;  %s536_s18 = smov (!%p120_p2), 96  }
   0x6   : > { %123 = sbr.rel (%p120_p2) target bundleno = 1197 (0x4ad), region = 28  ;;  %s537_s19 = smov (!%p120_p2), 88  }
   0x7   : > { %s538_s20 = smov (!%p120_p2), 120   ;;  %s539_s21 = smov (!%p120_p2), 64  }
   0x8   : > { %s540_s22 = smov (!%p120_p2), 80   ;;  %s541_s23 = smov (!%p120_p2), 72  }
   0x9   : > { %s542_s24 = smov (!%p120_p2), 112   ;;  %s543_s25 = smov (!%p120_p2), 104  }
   0xa   : > { %s544_s28 = smov (!%p120_p2), 56   ;;  %s545_s29 = smov (!%p120_p2), 40  }
   0xb   : > { %s640_s10 = smov (!%p142_p3, %s472_s10), 1  ;;  %vm167_vm0 = vcmask 64512   ;;  %vm204_vm1 = vcmask 1043456   ;;  %s546_s30 = smov 48   ;;  %vm403_vm2 = vcmask 130048   ;;  %vm405_vm3 = vcmask 195584  }
   0xc   : > { %s477_s11 = sshll.u32 %s640_s10, 2  ;;  %s148_s17 = scalar_lea.vmem %s637_s1, %s640_s10  ;;  %vm408_vm4 = vcmask 257024  }
   0xd   : > { %s145_s14 = scalar_lea.vmem %s636_s0, %s477_s11  ;;  %v511_v11 = vld [vmem:[%s148_s17] ss:$0 sm:$0xff]  ;;  %s547_s3 = smov 8  }
   0xe   : > { %v155_v0 = vld [vmem:[%s145_s14] sm:$0xf]  ;;  %s548_s4 = smov 16   ;;  %s549_s5 = smov 24  }
   0xf   : > { %v163_v1 = vunpack.c.l.b16 %v155_v0  ;;  %v156_v3 = vunpack.c.l.bf16 %v155_v0  ;;  %s152_s8 = scalar_lea.vmem %s638_s2, %s477_s11 }
  0x11   : > { %v585_v2 = vpack.c.b16 %v163_v1, %v163_v1  ;;  %v157_v6 = vmul.f32 0.35351563, %v156_v3 }
  0x13   : > { %165 = vrot.lane.b32.xlu0 %v585_v2, %s536_s18  ;;  %224 = vrot.lane.b32.xlu1 %v585_v2, %s537_s19  ;;  %v158_v7 = vpack.c.bf16 %v157_v6, %v157_v6 }
  0x15   : > { %222 = vrot.lane.b32.xlu2 %v158_v7, %s538_s20 }
  0x1d   : > { %199 = vrot.lane.b32.xlu2 %v585_v2, %s539_s21 }
  0x25   : > { %280 = vrot.lane.b32.xlu2 %v585_v2, %s540_s22 }
  0x2d   : > { %336 = vrot.lane.b32.xlu2 %v585_v2, %s541_s23 }
  0x35   : > { %278 = vrot.lane.b32.xlu2 %v158_v7, %s542_s24 }
  0x3d   : > { %334 = vrot.lane.b32.xlu2 %v158_v7, %s543_s25 }
  0x6f   : > { %v223_v10 = vpop.permute.xlu2 %222 }
  0x77   : > { %v200_v16 = vpop.permute.xlu2 %199 }
  0x78   : > { %v206_v21 = vsel %vm204_vm1, %v200_v16, 0 }
  0x79   : > { %215 = vmatpush.bf16.msra.mxu1 %v206_v21 }
  0x7f   : > { %v281_v17 = vpop.permute.xlu2 %280 }
  0x80   : > { %v286_v19 = vsel %vm167_vm0, %v281_v17, 0 }
  0x81   : > { %295 = vmatpush.bf16.xpose.msrb.mxu1 %v286_v19 }
  0x85   : > { %v166_v4 = vpop.permute.xlu0 %165  ;;  %v225_v8 = vpop.permute.xlu1 %224 }
  0x86   : > { %v172_v5 = vsel %vm167_vm0, %v166_v4, 0  ;;  %v230_v9 = vsel %vm167_vm0, %v225_v8, 0 }
  0x87   : > { %181 = vmatpush.bf16.xpose.msra.mxu0 %v172_v5  ;;  %239 = vmatpush.bf16.xpose.msra.mxu2 %v230_v9  ;;  %v337_v18 = vpop.permute.xlu2 %336 }
  0x88   : > { %v342_v20 = vsel %vm167_vm0, %v337_v18, 0 }
  0x8e   : > { %479 = vmatmul.msk.bf16.vlgmr.msra.gmra.mxu0 %vm167_vm0, %v158_v7  ;;  %481 = vmatmul.msk.bf16.vlgmr.msra.gmra.mxu2 %vm167_vm0, %v223_v10 }
  0x8f   : > { %351 = vmatpush.bf16.xpose.msrb.mxu0 %v342_v20  ;;  %v279_v22 = vpop.permute.xlu2 %278 }
  0x97   : > { %v335_v23 = vpop.permute.xlu2 %334 }
  0x9e   : > { %485 = vmatmul.msk.bf16.vlgmr.msrb.gmra.mxu0 %vm167_vm0, %v335_v23 }
 0x10b   : > { %v183_v12 = vpop.f32.mrf.mxu0 }
 0x10c   : > { %v184_v13 = vadd.f32 %v511_v11, %v183_v12 }
 0x10e   : > { %v187_v14 = vsel %vm167_vm0, %v184_v13, -inf }
 0x10f   : > { %188 = vmax.xlane.f32.xlu0 %v187_v14 }
 0x111   : > { %v241_v24 = vpop.f32.mrf.mxu2 }
 0x112   : > { %v242_v25 = vadd.f32 %v511_v11, %v241_v24 }
 0x113   : > { %v185_v15 = vpop.f32.mrf.mxu0 }
 0x114   : > { %v245_v27 = vsel %vm167_vm0, %v242_v25, -inf }
 0x115   : > { %246 = vmax.xlane.f32.xlu2 %v245_v27 }
 0x119   : > { %v243_v30 = vpop.f32.mrf.mxu2 }
 0x11b   : > { %v353_v33 = vpop.f32.mrf.mxu0 }
 0x11c   : > { %v354_v34 = vadd.f32 %v511_v11, %v353_v33 }
 0x11e   : > { %v357_v35 = vsel %vm167_vm0, %v354_v34, -inf }
 0x123   : > { %v355_v37 = vpop.f32.mrf.mxu0 }
 0x182   : > { %v189_v26 = vpop.xlane.xlu0 %188 }
 0x183   : > { %v190_v28 = vsub.f32 %v184_v13, %v189_v26 }
 0x185   : > { %v191_v29 = vmul.f32 1.442695, %v190_v28 }
 0x187   : > { %512 = vpow2.f32 %v191_v29 }
 0x188   : > { %v247_v42 = vpop.xlane.xlu2 %246 }
 0x189   : > { %v248_v44 = vsub.f32 %v242_v25, %v247_v42 }
 0x18b   : > { %v249_v45 = vmul.f32 1.442695, %v248_v44 }
 0x18d   : > { %v513_v31 = vpop.eup %512 }
 0x18e   : > { %v193_v32 = vsel %vm167_vm0, %v513_v31, 0.0 }
 0x18f   : > { %194 = vadd.xlane.f32.xlu1 %v193_v32 }
 0x197   : > { %358 = vmax.xlane.f32.xlu1 %v357_v35 }
 0x1b0   : > { %257 = vrot.lane.b32.xlu1 %v585_v2, %s544_s28 }
 0x1b8   : > { %369 = vrot.lane.b32.xlu1 %v585_v2, %s545_s29 }
 0x202   : > { %v195_v36 = vpop.xlane.xlu1 %194 }
 0x203   : > { %514 = vrcp.f32 %v195_v36 }
 0x204   : > { %516 = vpow2.f32 %v249_v45 }
 0x209   : > { %v515_v38 = vpop.eup %514 }
 0x20a   : > { %v197_v39 = vmul.f32 %v515_v38, %v513_v31  ;;  %v359_v46 = vpop.xlane.xlu1 %358  ;;  %v517_v52 = vpop.eup %516 }
 0x20b   : > { %v360_v49 = vsub.f32 %v354_v34, %v359_v46  ;;  %v251_v54 = vsel %vm167_vm0, %v517_v52, 0.0 }
 0x20c   : > { %v198_v40 = vpack.c.bf16 %v197_v39, %v197_v39 }
 0x20d   : > { %v361_v51 = vmul.f32 1.442695, %v360_v49 }
 0x20e   : > { %480 = vmatmul.msk.bf16.vlgmr.msra.gmra.mxu1 %vm167_vm0, %v198_v40 }
 0x20f   : > { %518 = vpow2.f32 %v361_v51 }
 0x215   : > { %v519_v55 = vpop.eup %518 }
 0x216   : > { %v363_v56 = vsel %vm167_vm0, %v519_v55, 0.0 }
 0x21e   : > { %483 = vmatmul.msk.bf16.vlgmr.msrb.gmra.mxu1 %vm167_vm0, %v279_v22 }
 0x222   : > { %v258_v57 = vpop.permute.xlu1 %257 }
 0x223   : > { %v263_v58 = vsel %vm204_vm1, %v258_v57, 0 }
 0x224   : > { %272 = vmatpush.bf16.msra.mxu3 %v263_v58 }
 0x22a   : > { %v370_v59 = vpop.permute.xlu1 %369 }
 0x22b   : > { %v375_v60 = vsel %vm204_vm1, %v370_v59, 0 }
 0x22c   : > { %384 = vmatpush.bf16.msrb.mxu2 %v375_v60 }
 0x28b   : > { %v613_v41 = vpop.f32.mrf.mxu1 }
 0x293   : > { %v219_v43 = vpop.f32.mrf.mxu1 }
 0x29b   : > { %v297_v47 = vpop.f32.mrf.mxu1 }
 0x29c   : > { %v298_v48 = vadd.f32 %v511_v11, %v297_v47 }
 0x29e   : > { %v301_v50 = vsel %vm167_vm0, %v298_v48, -inf }
 0x29f   : > { %302 = vmax.xlane.f32.xlu0 %v301_v50 }
 0x2a3   : > { %v299_v53 = vpop.f32.mrf.mxu1 }
 0x2a7   : > { %252 = vadd.xlane.f32.xlu0 %v251_v54 }
 0x2af   : > { %364 = vadd.xlane.f32.xlu0 %v363_v56 }
 0x312   : > { %v303_v61 = vpop.xlane.xlu0 %302 }
 0x313   : > { %v304_v62 = vsub.f32 %v298_v48, %v303_v61 }
 0x315   : > { %v305_v63 = vmul.f32 1.442695, %v304_v62 }
 0x317   : > { %520 = vpow2.f32 %v305_v63 }
 0x31a   : > { %v253_v0 = vpop.xlane.xlu0 %252 }
 0x31b   : > { %522 = vrcp.f32 %v253_v0 }
 0x31d   : > { %v521_v1 = vpop.eup %520 }
 0x31e   : > { %v307_v3 = vsel %vm167_vm0, %v521_v1, 0.0 }
 0x31f   : > { %308 = vadd.xlane.f32.xlu0 %v307_v3 }
 0x321   : > { %v523_v4 = vpop.eup %522 }
 0x322   : > { %v365_v5 = vpop.xlane.xlu0 %364  ;;  %v255_v6 = vmul.f32 %v523_v4, %v517_v52 }
 0x323   : > { %524 = vrcp.f32 %v365_v5 }
 0x324   : > { %v256_v7 = vpack.c.bf16 %v255_v6, %v255_v6 }
 0x326   : > { %482 = vmatmul.msk.bf16.vlgmr.msra.gmra.mxu3 %vm167_vm0, %v256_v7 }
 0x329   : > { %v525_v8 = vpop.eup %524 }
 0x32a   : > { %v367_v9 = vmul.f32 %v525_v8, %v519_v55 }
 0x32c   : > { %v368_v10 = vpack.c.bf16 %v367_v9, %v367_v9 }
 0x32e   : > { %486 = vmatmul.msk.bf16.vlgmr.msrb.gmra.mxu2 %vm167_vm0, %v368_v10 }
 0x333   : > { %313 = vrot.lane.b32.xlu0 %v585_v2, %s546_s30 }
 0x392   : > { %v309_v11 = vpop.xlane.xlu0 %308 }
 0x393   : > { %526 = vrcp.f32 %v309_v11 }
 0x399   : > { %v527_v12 = vpop.eup %526 }
 0x39a   : > { %v311_v13 = vmul.f32 %v527_v12, %v521_v1 }
 0x39c   : > { %v312_v16 = vpack.c.bf16 %v311_v13, %v311_v13 }
 0x3a5   : > { %v314_v14 = vpop.permute.xlu0 %313 }
 0x3a6   : > { %v319_v15 = vsel %vm204_vm1, %v314_v14, 0 }
 0x3a7   : > { %328 = vmatpush.bf16.msrb.mxu3 %v319_v15 }
 0x3a9   : > { %v274_v17 = vpop.f32.mrf.mxu3 }
 0x3aa   : > { %484 = vmatmul.msk.bf16.vlgmr.msrb.gmra.mxu3 %vm167_vm0, %v312_v16  ;;  %391 = vrot.lane.b32.xlu2 %v274_v17, %s547_s3 }
 0x3b1   : > { %v276_v18 = vpop.f32.mrf.mxu3  ;;  %v386_v19 = vpop.f32.mrf.mxu2 }
 0x3b9   : > { %v388_v20 = vpop.f32.mrf.mxu2 }
 0x404   : > { %v392_v23 = vpop.permute.xlu2 %391 }
 0x405   : > { %v402_v24 = vsel %vm167_vm0, %v613_v41, %v392_v23 }
 0x42d   : > { %v330_v21 = vpop.f32.mrf.mxu3 }
 0x42e   : > { %395 = vrot.lane.b32.xlu1 %v330_v21, %s548_s4 }
 0x435   : > { %v332_v2 = vpop.f32.mrf.mxu3 }
 0x436   : > { %399 = vrot.lane.b32.xlu1 %v386_v19, %s549_s5 }
 0x4a0   : > { %v396_v22 = vpop.permute.xlu1 %395 }
 0x4a1   : > { %v404_v25 = vsel %vm403_vm2, %v402_v24, %v396_v22 }
 0x4a8   : > { %v400_v26 = vpop.permute.xlu1 %399 }
 0x4a9   : > { %v406_v27 = vsel %vm405_vm3, %v404_v25, %v400_v26 }
 0x4aa   : > { %v407_v28 = vpack.c.bf16 %v406_v27, %v406_v27 }
 0x4ac   : > { %409 = vst.msk [vmem:[%s152_s8] sm:$0xf] %vm408_vm4, %v407_v28 }
 0x4ad PF: > { %s12_s9 = sadd.s32 1, %s534_s9  }
 0x4ae   : > { %p9_p4 = scmp.ge.s32.totalorder %s12_s9, 4  }
 0x4b0   :  { %11 = sbr.rel (!%p9_p4) target bundleno = 1 (0x1), region = 61 }

// kernel: bert_forward.19
= control target key start
LH: loop header
LB: loop body
LE: loop exit
PB: predicated region body
PF: predicated region fallthrough
CT: control target
= control target key end

     0   :  { %vm58_vm0 = vcmask 261120   ;;  %s253_s1 = inlined_call_operand.vmem [shape: bf16[32,256], index: 1, kind: input, shape index: {}]   ;;  %s254_s0 = inlined_call_operand.vmem [shape: bf16[16,32], index: 0, kind: input, shape index: {}]   ;;  %s255_s2 = inlined_call_operand.vmem [shape: bf16[1,256], index: 2, kind: input, shape index: {}]   ;;  %s256_s3 = inlined_call_operand.vmem [shape: bf16[16,256], index: 3, kind: output, shape index: {}]  }
   0x1   :  { %v176_v0 = vld [vmem:[%s253_s1 + $0x10] sm:$0xf]  ;;  %v188_v1 = vld [vmem:[%s253_s1 + $0x14] sm:$0xf0]  ;;  %v187_v2 = vld [vmem:[%s253_s1 + $0x14] sm:$0xf] }
   0x2   :  { %v177_v3 = vor.u32 %v188_v1, %v176_v0  ;;  %v178_v4 = vld [vmem:[%s253_s1 + $0x18] sm:$0xf0]  ;;  %v168_v5 = vld [vmem:[%s253_s1] sm:$0xf]  ;;  %v186_v6 = vld [vmem:[%s253_s1 + $0x4] sm:$0xf0] }
   0x3   :  { %v181_v7 = vor.u32 %v187_v2, %v178_v4  ;;  %v185_v8 = vld [vmem:[%s253_s1 + $0x4] sm:$0xf]  ;;  %v170_v9 = vld [vmem:[%s253_s1 + $0x8] sm:$0xf0]  ;;  %v169_v10 = vor.u32 %v186_v6, %v168_v5  ;;  %v105_v13 = vld [vmem:[%s255_s2] sm:$0x3] }
   0x4   :  { %68 = vmatpush.bf16.msra.mxu0 %v177_v3  ;;  %v173_v11 = vor.u32 %v185_v8, %v170_v9  ;;  %v184_v12 = vld [vmem:[%s254_s0] sm:$0xff]  ;;  %v106_v14 = vunpack.c.l.bf16 %v105_v13 }
   0x5   :  { %82 = vmatpush.bf16.msra.mxu1 %v181_v7 }
   0x6   :  { %v108_v15 = vperm.slane %v106_v14, 0  ;;  %v109_v16 = vperm.slane %v106_v14, 2 }
   0x8   :  { %69 = vmatpush.bf16.msra.mxu0 %v169_v10  ;;  %v112_v17 = vperm.slane %v108_v15, 0  ;;  %v113_v18 = vperm.slane %v109_v16, 0 }
   0x9   :  { %83 = vmatpush.bf16.msra.mxu1 %v173_v11 }
   0xb   :  { %182 = vmatmul.msk.bf16.vlgmr.msra.gmra.mxu0 %vm58_vm0, %v184_v12 }
   0xc   :  { %183 = vmatmul.msk.bf16.vlgmr.msra.gmra.mxu1 %vm58_vm0, %v184_v12 }
  0x88   :  { %v71_v19 = vpop.f32.mrf.mxu0 }
  0x89   :  { %v114_v20 = vadd.f32 %v112_v17, %v71_v19  ;;  %v85_v21 = vpop.f32.mrf.mxu1 }
  0x8a   :  { %v115_v22 = vadd.f32 %v113_v18, %v85_v21 }
  0x8b   :  { %v122_v23 = vmul.f32 0.044715, %v114_v20  ;;  %v118_v48 = vmul.f32 0.5, %v114_v20 }
  0x8c   :  { %v123_v24 = vmul.f32 0.044715, %v115_v22  ;;  %v119_v51 = vmul.f32 0.5, %v115_v22 }
  0x8d   :  { %v126_v25 = vmul.f32 %v122_v23, %v114_v20 }
  0x8e   :  { %v127_v26 = vmul.f32 %v123_v24, %v115_v22 }
  0x8f   :  { %v130_v27 = vmul.f32 %v126_v25, %v114_v20 }
  0x90   :  { %v131_v28 = vmul.f32 %v127_v26, %v115_v22  ;;  %v73_v29 = vpop.f32.mrf.mxu0 }
  0x91   :  { %v134_v30 = vadd.f32 %v130_v27, %v114_v20  ;;  %v116_v31 = vadd.f32 %v112_v17, %v73_v29  ;;  %v87_v32 = vpop.f32.mrf.mxu1 }
  0x92   :  { %v135_v33 = vadd.f32 %v131_v28, %v115_v22  ;;  %v117_v34 = vadd.f32 %v113_v18, %v87_v32 }
  0x93   :  { %v138_v35 = vmul.f32 0.7978846, %v134_v30  ;;  %v124_v36 = vmul.f32 0.044715, %v116_v31  ;;  %v120_v58 = vmul.f32 0.5, %v116_v31 }
  0x94   :  { %v139_v37 = vmul.f32 0.7978846, %v135_v33  ;;  %v125_v38 = vmul.f32 0.044715, %v117_v34  ;;  %v121_v60 = vmul.f32 0.5, %v117_v34 }
  0x95   :  { %189 = vtanh.f32 %v138_v35  ;;  %v128_v39 = vmul.f32 %v124_v36, %v116_v31 }
  0x96   :  { %191 = vtanh.f32 %v139_v37  ;;  %v129_v40 = vmul.f32 %v125_v38, %v117_v34 }
  0x97   :  { %v132_v41 = vmul.f32 %v128_v39, %v116_v31 }
  0x98   :  { %v133_v42 = vmul.f32 %v129_v40, %v117_v34 }
  0x99   :  { %v136_v43 = vadd.f32 %v132_v41, %v116_v31 }
  0x9a   :  { %v137_v44 = vadd.f32 %v133_v42, %v117_v34 }
  0x9b   :  { %v190_v45 = vpop.eup %189  ;;  %v140_v46 = vmul.f32 0.7978846, %v136_v43 }
  0x9c   :  { %v192_v47 = vpop.eup %191  ;;  %v146_v49 = vadd.f32 1.0, %v190_v45  ;;  %v141_v50 = vmul.f32 0.7978846, %v137_v44 }
  0x9d   :  { %v147_v52 = vadd.f32 1.0, %v192_v47  ;;  %193 = vtanh.f32 %v140_v46 }
  0x9e   :  { %v150_v53 = vmul.f32 %v146_v49, %v118_v48  ;;  %195 = vtanh.f32 %v141_v50 }
  0x9f   :  { %v151_v54 = vmul.f32 %v147_v52, %v119_v51 }
  0xa1   :  { %v154_v55 = vpack.c.bf16 %v151_v54, %v150_v53 }
  0xa3   :  { %v194_v56 = vpop.eup %193  ;;  %156 = vst [vmem:[%s256_s3] sm:$0xff] %v154_v55 }
  0xa4   :  { %v196_v57 = vpop.eup %195  ;;  %v148_v59 = vadd.f32 1.0, %v194_v56 }
  0xa5   :  { %v149_v61 = vadd.f32 1.0, %v196_v57 }
  0xa6   :  { %v152_v62 = vmul.f32 %v148_v59, %v120_v58 }
  0xa7   :  { %v153_v63 = vmul.f32 %v149_v61, %v121_v60 }
  0xa9   :  { %v155_v0 = vpack.c.bf16 %v153_v63, %v152_v62 }
  0xab   :  { %157 = vst [vmem:[%s256_s3 + $0x8] sm:$0xff] %v155_v0 }

// kernel: bert_forward.20
= control target key start
LH: loop header
LB: loop body
LE: loop exit
PB: predicated region body
PF: predicated region fallthrough
CT: control target
= control target key end

     0   :  { %vm28_vm0 = vcmask 261120   ;;  %v219_v1 = vmov 0.0   ;;  %vm72_vm1 = vcmask 523264   ;;  %v220_v26 = vmov 32.0   ;;  %s297_s1 = inlined_call_operand.vmem [shape: bf16[64,32], index: 1, kind: input, shape index: {}]   ;;  %s298_s0 = inlined_call_operand.vmem [shape: bf16[16,64], index: 0, kind: input, shape index: {}]   ;;  %s299_s2 = inlined_call_operand.vmem [shape: bf16[1,32], index: 2, kind: input, shape index: {}]   ;;  %s300_s3 = inlined_call_operand.vmem [shape: bf16[16,32], index: 3, kind: input, shape index: {}]   ;;  %s301_s4 = inlined_call_operand.vmem [shape: bf16[1,32], index: 4, kind: input, shape index: {}]   ;;  %s302_s5 = inlined_call_operand.vmem [shape: bf16[1,32], index: 5, kind: input, shape index: {}]   ;;  %s303_s6 = inlined_call_operand.vmem [shape: bf16[16,32], index: 6, kind: output, shape index: {}]  }
   0x1   :  { %v206_v0 = vld [vmem:[%s297_s1 + $0x18] sm:$0xff]  ;;  %29 = vst.msk [vmem:[#allocation2] sm:$0xff] %vm28_vm0, %v219_v1  ;;  %v205_v2 = vld [vmem:[%s297_s1 + $0x10] sm:$0xff]  ;;  %v204_v3 = vld [vmem:[%s297_s1 + $0x8] sm:$0xff]  ;;  %213 = vrcp.f32 %v220_v26  ;;  %vm174_vm7 = vcmask 257024  }
   0x2   :  { %30 = vst.msk [vmem:[#allocation2 + $0x8] sm:$0xff] %vm28_vm0, %v219_v1  ;;  %80 = vmatpush.bf16.msra.mxu0 %v206_v0  ;;  %v203_v4 = vld [vmem:[%s297_s1] sm:$0xff] }
   0x3   :  { %v202_v5 = vld [vmem:[%s298_s0] sm:$0xff] }
   0x4   :  { %v100_v8 = vld [vmem:[%s299_s2] sm:$0x1] }
   0x5   :  { %v101_v10 = vunpack.c.l.bf16 %v100_v8  ;;  %v208_v12 = vld [vmem:[%s300_s3] sm:$0xff]  }
   0x6   :  { %81 = vmatpush.bf16.msra.mxu0 %v205_v2  ;;  %v209_v16 = vunpack.c.l.bf16 %v208_v12  ;;  %v210_v21 = vunpack.c.h.bf16 %v208_v12  ;;  %v162_v51 = vld [vmem:[%s301_s4] sm:$0x1] }
   0x7   :  { %v102_v13 = vperm.slane %v101_v10, 0  ;;  %v214_v27 = vpop.eup %213  ;;  %v167_v53 = vld [vmem:[%s302_s5] sm:$0x1]  ;;  %v163_v55 = vunpack.c.l.bf16 %v162_v51 }
   0x8   :  { %v31_v6 = vld [vmem:[#allocation2] sm:$0xff]  ;;  %v118_v28 = vmul.f32 32.0, %v214_v27  ;;  %vm122_vm2 = vweird.f32 %v214_v27  ;;  %v168_v58 = vunpack.c.l.bf16 %v167_v53 }
   0x9   :  { %v32_v11 = vld [vmem:[#allocation2 + $0x8] sm:$0xff]  ;;  %v164_v61 = vperm.slane %v163_v55, 0 }
   0xa   :  { %82 = vmatpush.bf16.msra.mxu0 %v204_v3  ;;  %v119_v29 = vsub.f32 1.0, %v118_v28  ;;  %v169_v0 = vperm.slane %v168_v58, 0 }
   0xc   :  { %v120_v30 = vmul.f32 %v214_v27, %v119_v29 }
   0xe   :  { %83 = vmatpush.bf16.msra.mxu0 %v203_v4  ;;  %v121_v31 = vadd.f32 %v214_v27, %v120_v30 }
  0x10   :  { %v123_v32 = vsel %vm122_vm2, %v214_v27, %v121_v31 }
  0x11   :  { %201 = vmatmul.msk.bf16.vlgmr.msra.gmra.mxu0 %vm72_vm1, %v202_v5 }
  0x8e   :  { %v85_v7 = vpop.f32.mrf.mxu0 }
  0x8f   :  { %v90_v9 = vadd.f32 %v85_v7, %v31_v6 }
  0x91   :  { %93 = vst.msk [vmem:[#allocation2] sm:$0xff] %vm28_vm0, %v90_v9 }
  0x96   :  { %v87_v14 = vpop.f32.mrf.mxu0 }
  0x97   :  { %v91_v15 = vadd.f32 %v87_v14, %v32_v11 }
  0x98   :  { %v98_v17 = vld [vmem:[#allocation2] sm:$0xff] }
  0x99   :  { %94 = vst.msk [vmem:[#allocation2 + $0x8] sm:$0xff] %vm28_vm0, %v91_v15  ;;  %v103_v18 = vadd.f32 %v102_v13, %v98_v17 }
  0x9b   :  { %v109_v19 = vadd.f32 %v209_v16, %v103_v18 }
  0x9d   :  { %v111_v20 = vsel %vm28_vm0, %v109_v19, 0.0 }
  0x9e   :  { %112 = vadd.xlane.f32.xlu0 %v111_v20 }
  0xa0   :  { %v99_v22 = vld [vmem:[#allocation2 + $0x8] sm:$0xff] }
  0xa1   :  { %v104_v23 = vadd.f32 %v102_v13, %v99_v22 }
  0xa3   :  { %v110_v24 = vadd.f32 %v210_v21, %v104_v23 }
  0xa5   :  { %v114_v25 = vsel %vm28_vm0, %v110_v24, 0.0 }
  0xa6   :  { %115 = vadd.xlane.f32.xlu0 %v114_v25 }
 0x111   :  { %v113_v33 = vpop.xlane.xlu0 %112 }
 0x112   :  { %v124_v34 = vmul.f32 %v123_v32, %v113_v33 }
 0x114   :  { %v126_v35 = vsub.f32 %v109_v19, %v124_v34 }
 0x116   :  { %v128_v36 = vmul.f32 %v126_v35, %v126_v35 }
 0x118   :  { %v130_v37 = vsel %vm28_vm0, %v128_v36, 0.0 }
 0x119   :  { %131 = vadd.xlane.f32.xlu1 %v130_v37  ;;  %v116_v38 = vpop.xlane.xlu0 %115 }
 0x11a   :  { %v125_v39 = vmul.f32 %v123_v32, %v116_v38 }
 0x11c   :  { %v127_v40 = vsub.f32 %v110_v24, %v125_v39 }
 0x11e   :  { %v129_v41 = vmul.f32 %v127_v40, %v127_v40 }
 0x120   :  { %v133_v42 = vsel %vm28_vm0, %v129_v41, 0.0 }
 0x121   :  { %134 = vadd.xlane.f32.xlu1 %v133_v42 }
 0x18c   :  { %v132_v43 = vpop.xlane.xlu1 %131 }
 0x18d   :  { %v136_v44 = vmul.f32 %v132_v43, %v123_v32 }
 0x18f   :  { %v138_v45 = vadd.f32 1e-12, %v136_v44 }
 0x191   :  { %215 = vrsqrt.f32 %v138_v45  ;;  %vm146_vm4 = vweird.f32 %v138_v45 }
 0x194   :  { %v135_v46 = vpop.xlane.xlu1 %134 }
 0x195   :  { %v137_v47 = vmul.f32 %v135_v46, %v123_v32 }
 0x197   :  { %v216_v48 = vpop.eup %215  ;;  %v139_v49 = vadd.f32 1e-12, %v137_v47 }
 0x198   :  { %v141_v50 = vmul.f32 %v216_v48, %v138_v45  ;;  %vm147_vm3 = vweird.f32 %v216_v48 }
 0x199   :  { %217 = vrsqrt.f32 %v139_v49  ;;  %vm148_vm5 = vmor %vm146_vm4, %vm147_vm3  ;;  %vm156_vm8 = vweird.f32 %v139_v49 }
 0x19a   :  { %v142_v52 = vmul.f32 %v216_v48, %v141_v50 }
 0x19c   :  { %v143_v54 = vmul.f32 0.5, %v142_v52 }
 0x19e   :  { %v144_v56 = vsub.f32 1.5, %v143_v54 }
 0x19f   :  { %v218_v57 = vpop.eup %217 }
 0x1a0   :  { %v145_v59 = vmul.f32 %v216_v48, %v144_v56  ;;  %v151_v60 = vmul.f32 %v218_v57, %v139_v49  ;;  %vm157_vm6 = vweird.f32 %v218_v57 }
 0x1a1   :  { %vm158_vm9 = vmor %vm156_vm8, %vm157_vm6 }
 0x1a2   :  { %v149_v62 = vsel %vm148_vm5, %v216_v48, %v145_v59  ;;  %v152_v63 = vmul.f32 %v218_v57, %v151_v60 }
 0x1a3   :  { %v160_v1 = vmul.f32 %v149_v62, %v126_v35 }
 0x1a4   :  { %v153_v2 = vmul.f32 0.5, %v152_v63 }
 0x1a5   :  { %v165_v3 = vmul.f32 %v164_v61, %v160_v1 }
 0x1a6   :  { %v154_v4 = vsub.f32 1.5, %v153_v2 }
 0x1a7   :  { %v170_v5 = vadd.f32 %v169_v0, %v165_v3 }
 0x1a8   :  { %v155_v6 = vmul.f32 %v218_v57, %v154_v4 }
 0x1a9   :  { %v172_v7 = vpack.c.bf16 %v170_v5, %v170_v5 }
 0x1aa   :  { %v159_v8 = vsel %vm158_vm9, %v218_v57, %v155_v6 }
 0x1ab   :  { %175 = vst.msk [vmem:[%s303_s6] sm:$0xf] %vm174_vm7, %v172_v7  ;;  %v161_v9 = vmul.f32 %v159_v8, %v127_v40 }
 0x1ad   :  { %v166_v10 = vmul.f32 %v164_v61, %v161_v9 }
 0x1af   :  { %v171_v11 = vadd.f32 %v169_v0, %v166_v10 }
 0x1b1   :  { %v173_v12 = vpack.c.bf16 %v171_v11, %v171_v11 }
 0x1b3   :  { %176 = vst.msk [vmem:[%s303_s6 + $0x4] sm:$0xf] %vm174_vm7, %v173_v12 }

// kernel: bert_forward.27
= control target key start
LH: loop header
LB: loop body
LE: loop exit
PB: predicated region body
PF: predicated region fallthrough
CT: control target
= control target key end

     0   :  { %vm25_vm0 = vcmask 261120   ;;  %v201_v1 = vmov 0.0   ;;  %v202_v37 = vmov 32.0   ;;  %vm166_vm6 = vcmask 257024   ;;  %s266_s1 = inlined_call_operand.vmem [shape: bf16[32,32], index: 1, kind: input, shape index: {}]   ;;  %s267_s0 = inlined_call_operand.vmem [shape: bf16[16,32], index: 0, kind: input, shape index: {}]   ;;  %s268_s2 = inlined_call_operand.vmem [shape: bf16[1,32], index: 2, kind: input, shape index: {}]   ;;  %s269_s3 = inlined_call_operand.vmem [shape: bf16[1,32], index: 3, kind: input, shape index: {}]   ;;  %s270_s4 = inlined_call_operand.vmem [shape: bf16[1,32], index: 4, kind: input, shape index: {}]   ;;  %s271_s5 = inlined_call_operand.vmem [shape: bf16[16,32], index: 5, kind: output, shape index: {}]  }
   0x1   :  { %v188_v0 = vld [vmem:[%s266_s1 + $0x8] sm:$0xff]  ;;  %26 = vst.msk [vmem:[#allocation2] sm:$0xff] %vm25_vm0, %v201_v1  ;;  %v187_v2 = vld [vmem:[%s266_s1] sm:$0xff] }
   0x2   :  { %27 = vst.msk [vmem:[#allocation2 + $0x8] sm:$0xff] %vm25_vm0, %v201_v1  ;;  %63 = vmatpush.bf16.msra.mxu0 %v188_v0  ;;  %v186_v3 = vld [vmem:[%s267_s0] sm:$0xff] }
   0x3   :  { %v80_v6 = vld [vmem:[%s268_s2] sm:$0x1] }
   0x4   :  { %v81_v8 = vunpack.c.l.bf16 %v80_v6  ;;  %v154_v62 = vld [vmem:[%s269_s3] sm:$0x1] }
   0x5   :  { %v159_v0 = vld [vmem:[%s270_s4] sm:$0x1] }
   0x6   :  { %64 = vmatpush.bf16.msra.mxu0 %v187_v2  ;;  %v82_v10 = vperm.slane %v81_v8, 0  ;;  %v155_v2 = vunpack.c.l.bf16 %v154_v62 }
   0x8   :  { %v28_v4 = vld [vmem:[#allocation2] sm:$0xff]  ;;  %v156_v8 = vperm.slane %v155_v2, 0 }
   0x9   :  { %185 = vmatmul.msk.bf16.vlgmr.msra.gmra.mxu0 %vm25_vm0, %v186_v3  ;;  %v29_v9 = vld [vmem:[#allocation2 + $0x8] sm:$0xff] }
  0x86   :  { %v66_v5 = vpop.f32.mrf.mxu0 }
  0x87   :  { %v71_v7 = vadd.f32 %v66_v5, %v28_v4  ;;  %v160_v5 = vunpack.c.l.bf16 %v159_v0 }
  0x89   :  { %73 = vst.msk [vmem:[#allocation2] sm:$0xff] %vm25_vm0, %v71_v7 }
  0x8e   :  { %v68_v11 = vpop.f32.mrf.mxu0 }
  0x8f   :  { %v72_v12 = vadd.f32 %v68_v11, %v29_v9  ;;  %v161_v11 = vperm.slane %v160_v5, 0 }
  0x90   :  { %v78_v13 = vld [vmem:[#allocation2] sm:$0xff] }
  0x91   :  { %74 = vst.msk [vmem:[#allocation2 + $0x8] sm:$0xff] %vm25_vm0, %v72_v12  ;;  %v83_v14 = vadd.f32 %v82_v10, %v78_v13 }
  0x93   :  { %v87_v15 = vmul.f32 0.044715, %v83_v14  ;;  %v85_v28 = vmul.f32 0.5, %v83_v14 }
  0x95   :  { %v89_v16 = vmul.f32 %v87_v15, %v83_v14 }
  0x97   :  { %v91_v17 = vmul.f32 %v89_v16, %v83_v14 }
  0x98   :  { %v79_v18 = vld [vmem:[#allocation2 + $0x8] sm:$0xff] }
  0x99   :  { %v93_v19 = vadd.f32 %v91_v17, %v83_v14  ;;  %v84_v20 = vadd.f32 %v82_v10, %v79_v18 }
  0x9b   :  { %v95_v21 = vmul.f32 0.7978846, %v93_v19  ;;  %v88_v22 = vmul.f32 0.044715, %v84_v20  ;;  %v86_v33 = vmul.f32 0.5, %v84_v20 }
  0x9d   :  { %191 = vtanh.f32 %v95_v21  ;;  %v90_v23 = vmul.f32 %v88_v22, %v84_v20 }
  0x9f   :  { %v92_v24 = vmul.f32 %v90_v23, %v84_v20 }
  0xa1   :  { %v94_v25 = vadd.f32 %v92_v24, %v84_v20 }
  0xa3   :  { %v192_v26 = vpop.eup %191  ;;  %v96_v27 = vmul.f32 0.7978846, %v94_v25 }
  0xa4   :  { %v99_v29 = vadd.f32 1.0, %v192_v26 }
  0xa5   :  { %193 = vtanh.f32 %v96_v27 }
  0xa6   :  { %v101_v30 = vmul.f32 %v99_v29, %v85_v28  ;;  %195 = vrcp.f32 %v202_v37 }
  0xa8   :  { %v103_v31 = vsel %vm25_vm0, %v101_v30, 0.0 }
  0xa9   :  { %104 = vadd.xlane.f32.xlu0 %v103_v31 }
  0xab   :  { %v194_v32 = vpop.eup %193 }
  0xac   :  { %v100_v34 = vadd.f32 1.0, %v194_v32  ;;  %v196_v38 = vpop.eup %195 }
  0xad   :  { %v110_v39 = vmul.f32 32.0, %v196_v38  ;;  %vm114_vm1 = vweird.f32 %v196_v38 }
  0xae   :  { %v102_v35 = vmul.f32 %v100_v34, %v86_v33 }
  0xaf   :  { %v111_v40 = vsub.f32 1.0, %v110_v39 }
  0xb0   :  { %v106_v36 = vsel %vm25_vm0, %v102_v35, 0.0 }
  0xb1   :  { %107 = vadd.xlane.f32.xlu0 %v106_v36  ;;  %v112_v41 = vmul.f32 %v196_v38, %v111_v40 }
  0xb3   :  { %v113_v42 = vadd.f32 %v196_v38, %v112_v41 }
  0xb5   :  { %v115_v43 = vsel %vm114_vm1, %v196_v38, %v113_v42 }
 0x11c   :  { %v105_v44 = vpop.xlane.xlu0 %104 }
 0x11d   :  { %v116_v45 = vmul.f32 %v115_v43, %v105_v44 }
 0x11f   :  { %v118_v46 = vsub.f32 %v101_v30, %v116_v45 }
 0x121   :  { %v120_v47 = vmul.f32 %v118_v46, %v118_v46 }
 0x123   :  { %v122_v48 = vsel %vm25_vm0, %v120_v47, 0.0 }
 0x124   :  { %123 = vadd.xlane.f32.xlu1 %v122_v48  ;;  %v108_v49 = vpop.xlane.xlu0 %107 }
 0x125   :  { %v117_v50 = vmul.f32 %v115_v43, %v108_v49 }
 0x127   :  { %v119_v51 = vsub.f32 %v102_v35, %v117_v50 }
 0x129   :  { %v121_v52 = vmul.f32 %v119_v51, %v119_v51 }
 0x12b   :  { %v125_v53 = vsel %vm25_vm0, %v121_v52, 0.0 }
 0x12c   :  { %126 = vadd.xlane.f32.xlu1 %v125_v53 }
 0x197   :  { %v124_v54 = vpop.xlane.xlu1 %123 }
 0x198   :  { %v128_v55 = vmul.f32 %v124_v54, %v115_v43 }
 0x19a   :  { %v130_v56 = vadd.f32 1e-12, %v128_v55 }
 0x19c   :  { %197 = vrsqrt.f32 %v130_v56  ;;  %vm138_vm3 = vweird.f32 %v130_v56 }
 0x19f   :  { %v127_v57 = vpop.xlane.xlu1 %126 }
 0x1a0   :  { %v129_v58 = vmul.f32 %v127_v57, %v115_v43 }
 0x1a2   :  { %v198_v59 = vpop.eup %197  ;;  %v131_v60 = vadd.f32 1e-12, %v129_v58 }
 0x1a3   :  { %v133_v61 = vmul.f32 %v198_v59, %v130_v56  ;;  %vm139_vm2 = vweird.f32 %v198_v59 }
 0x1a4   :  { %199 = vrsqrt.f32 %v131_v60  ;;  %vm140_vm4 = vmor %vm138_vm3, %vm139_vm2  ;;  %vm148_vm7 = vweird.f32 %v131_v60 }
 0x1a5   :  { %v134_v63 = vmul.f32 %v198_v59, %v133_v61 }
 0x1a7   :  { %v135_v1 = vmul.f32 0.5, %v134_v63 }
 0x1a9   :  { %v136_v3 = vsub.f32 1.5, %v135_v1 }
 0x1aa   :  { %v200_v4 = vpop.eup %199 }
 0x1ab   :  { %v137_v6 = vmul.f32 %v198_v59, %v136_v3  ;;  %v143_v7 = vmul.f32 %v200_v4, %v131_v60  ;;  %vm149_vm5 = vweird.f32 %v200_v4 }
 0x1ac   :  { %vm150_vm8 = vmor %vm148_vm7, %vm149_vm5 }
 0x1ad   :  { %v141_v9 = vsel %vm140_vm4, %v198_v59, %v137_v6  ;;  %v144_v10 = vmul.f32 %v200_v4, %v143_v7 }
 0x1ae   :  { %v152_v12 = vmul.f32 %v141_v9, %v118_v46 }
 0x1af   :  { %v145_v13 = vmul.f32 0.5, %v144_v10 }
 0x1b0   :  { %v157_v14 = vmul.f32 %v156_v8, %v152_v12 }
 0x1b1   :  { %v146_v15 = vsub.f32 1.5, %v145_v13 }
 0x1b2   :  { %v162_v16 = vadd.f32 %v161_v11, %v157_v14 }
 0x1b3   :  { %v147_v17 = vmul.f32 %v200_v4, %v146_v15 }
 0x1b4   :  { %v164_v18 = vpack.c.bf16 %v162_v16, %v162_v16 }
 0x1b5   :  { %v151_v19 = vsel %vm150_vm8, %v200_v4, %v147_v17 }
 0x1b6   :  { %167 = vst.msk [vmem:[%s271_s5] sm:$0xf] %vm166_vm6, %v164_v18  ;;  %v153_v20 = vmul.f32 %v151_v19, %v119_v51 }
 0x1b8   :  { %v158_v21 = vmul.f32 %v156_v8, %v153_v20 }
 0x1ba   :  { %v163_v22 = vadd.f32 %v161_v11, %v158_v21 }
 0x1bc   :  { %v165_v23 = vpack.c.bf16 %v163_v22, %v163_v22 }
 0x1be   :  { %168 = vst.msk [vmem:[%s271_s5 + $0x4] sm:$0xf] %vm166_vm6, %v165_v23 }

// kernel: bert_forward.28
= control target key start
LH: loop header
LB: loop body
LE: loop exit
PB: predicated region body
PF: predicated region fallthrough
CT: control target
= control target key end

     0   :  { %vm86_vm0 = vcmask 261120   ;;  %s309_s0 = inlined_call_operand.vmem [shape: bf16[16,32], index: 0, kind: input, shape index: {}]   ;;  %s310_s1 = inlined_call_operand.vmem [shape: bf16[128,32], index: 1, kind: input, shape index: {}]   ;;  %s311_s2 = inlined_call_operand.vmem [shape: bf16[1,128], index: 2, kind: input, shape index: {}]   ;;  %s312_s3 = inlined_call_operand.hbm [shape: bf16[16,128], index: 3, kind: output, shape index: {}]  }
   0x1   :  { %v209_v0 = vld [vmem:[%s310_s1 + $0x38] sm:$0xff] }
   0x2   :  { %8 = vsyncpa [#allocation4], 0  ;;  %v112_v1 = vsel %vm86_vm0, %v209_v0, 0  ;;  %v208_v2 = vld [vmem:[%s310_s1 + $0x30] sm:$0xff]  ;;  %v207_v4 = vld [vmem:[%s310_s1 + $0x28] sm:$0xff]  ;;  %s244_s5 = smov [#allocation3]  }
   0x3   :  { %114 = vmatpush.bf16.xpose.msra.mxu0 %v112_v1  ;;  %v109_v3 = vsel %vm86_vm0, %v208_v2, 0  ;;  %v106_v5 = vsel %vm86_vm0, %v207_v4, 0  ;;  %v206_v6 = vld [vmem:[%s310_s1 + $0x20] sm:$0xff]  ;;  %v205_v8 = vld [vmem:[%s310_s1 + $0x18] sm:$0xff]  ;;  %v204_v10 = vld [vmem:[%s310_s1 + $0x10] sm:$0xff]  ;;  %s150_s6 = sshll.u32 %s244_s5, 4  ;;  %s151_s6 = int_to_ptr.vmem [resolvable:$true] %s150_s6 }
   0x4   :  { %v103_v7 = vsel %vm86_vm0, %v206_v6, 0  ;;  %v100_v9 = vsel %vm86_vm0, %v205_v8, 0  ;;  %v97_v11 = vsel %vm86_vm0, %v204_v10, 0  ;;  %v203_v12 = vld [vmem:[%s310_s1 + $0x8] sm:$0xff]  ;;  %v202_v14 = vld [vmem:[%s310_s1] sm:$0xff]  ;;  %s152_s8 = sshll.u32 %s312_s3, 4  ;;  %s153_s8 = int_to_ptr.hbm [resolvable:$true] %s152_s8 }
   0x5   :  { %v94_v13 = vsel %vm86_vm0, %v203_v12, 0  ;;  %v91_v15 = vsel %vm86_vm0, %v202_v14, 0  ;;  %v201_v16 = vld [vmem:[%s309_s0] sm:$0xff]  ;;  %s245_s0 = smov 64   ;;  %s246_s9 = smov 4  }
   0x6   :  { %v137_v17 = vld [vmem:[%s311_s2] sm:$0x1] }
   0x7   :  { %v138_v19 = vunpack.c.l.bf16 %v137_v17 }
   0x9   :  { %v139_v20 = vperm.slane %v138_v19, 0 }
   0xb   :  { %115 = vmatpush.bf16.xpose.msra.mxu0 %v109_v3 }
  0x13   :  { %116 = vmatpush.bf16.xpose.msra.mxu0 %v106_v5 }
  0x1b   :  { %117 = vmatpush.bf16.xpose.msra.mxu0 %v103_v7 }
  0x23   :  { %118 = vmatpush.bf16.xpose.msra.mxu0 %v100_v9 }
  0x2b   :  { %119 = vmatpush.bf16.xpose.msra.mxu0 %v97_v11 }
  0x33   :  { %120 = vmatpush.bf16.xpose.msra.mxu0 %v94_v13 }
  0x3b   :  { %121 = vmatpush.bf16.xpose.msra.mxu0 %v91_v15 }
  0x42   :  { %200 = vmatmul.msk.bf16.vlgmr.msra.gmra.mxu0 %vm86_vm0, %v201_v16 }
  0xbf   :  { %v123_v18 = vpop.f32.mrf.mxu0 }
  0xc0   :  { %v140_v22 = vadd.f32 %v139_v20, %v123_v18 }
  0xc7   :  { %v125_v21 = vpop.f32.mrf.mxu0 }
  0xc8   :  { %v141_v23 = vadd.f32 %v139_v20, %v125_v21 }
  0xca   :  { %v213_v24 = vpack.c.bf16 %v141_v23, %v140_v22 }
  0xcc   :  { %214 = vst [vmem:[#allocation3] sm:$0xff] %v213_v24  }
  0xcd   :  { %158 = dma.vmem_to_hbm [thread:$0]  %s151_s6, 128, %s153_s8, [#allocation4], %s245_s0, %s245_s0, %s246_s9  }
  0xce   :  { %242 = dma.done.wait [#allocation4], 128  }
  0xcf   :  { %243 = vsyncadd [#allocation4], 4294967168 }
  0xd0   :  { %163 = vsyncpa [#allocation4], 1 }

// kernel: bert_forward.29
= control target key start
LH: loop header
LB: loop body
LE: loop exit
PB: predicated region body
PF: predicated region fallthrough
CT: control target
= control target key end

     0   :  { %vm46_vm0 = vcmask 261120   ;;  %v145_v13 = vmov 0.0   ;;  %vm79_vm1 = vcmask 1041408   ;;  %vm112_vm2 = vcmask 1040384   ;;  %s199_s1 = inlined_call_operand.vmem [shape: bf16[32,256], index: 1, kind: input, shape index: {}]   ;;  %s200_s0 = inlined_call_operand.vmem [shape: bf16[2,32], index: 0, kind: input, shape index: {}]   ;;  %s201_s2 = inlined_call_operand.vmem [shape: bf16[1,256], index: 2, kind: input, shape index: {}]   ;;  %s202_s3 = inlined_call_operand.vmem [shape: bf16[2,256], index: 3, kind: output, shape index: {}]  }
   0x1   :  { %v132_v0 = vld [vmem:[%s199_s1 + $0x10] sm:$0xf]  ;;  %v143_v1 = vld [vmem:[%s199_s1 + $0x14] sm:$0xf0]  ;;  %v142_v2 = vld [vmem:[%s199_s1 + $0x14] sm:$0xf] }
   0x2   :  { %v133_v3 = vor.u32 %v143_v1, %v132_v0  ;;  %v134_v4 = vld [vmem:[%s199_s1 + $0x18] sm:$0xf0]  ;;  %v124_v5 = vld [vmem:[%s199_s1] sm:$0xf]  ;;  %v141_v6 = vld [vmem:[%s199_s1 + $0x4] sm:$0xf0] }
   0x3   :  { %v137_v7 = vor.u32 %v142_v2, %v134_v4  ;;  %v140_v8 = vld [vmem:[%s199_s1 + $0x4] sm:$0xf]  ;;  %v126_v9 = vld [vmem:[%s199_s1 + $0x8] sm:$0xf0]  ;;  %v125_v10 = vor.u32 %v141_v6, %v124_v5  ;;  %v21_v12 = vld [vmem:[%s200_s0] sm:$0x1] }
   0x4   :  { %56 = vmatpush.bf16.msra.mxu0 %v133_v3  ;;  %v129_v11 = vor.u32 %v140_v8, %v126_v9  ;;  %19 = vst [vmem:[#allocation2] sm:$0xf] %v145_v13  ;;  %v88_v14 = vld [vmem:[%s201_s2] sm:$0x3] }
   0x5   :  { %69 = vmatpush.bf16.msra.mxu1 %v137_v7  ;;  %v89_v15 = vunpack.c.l.bf16 %v88_v14 }
   0x7   :  { %v92_v17 = vperm.slane %v89_v15, 2  ;;  %v91_v22 = vperm.slane %v89_v15, 0 }
   0x8   :  { %57 = vmatpush.bf16.msra.mxu0 %v125_v10 }
   0x9   :  { %70 = vmatpush.bf16.msra.mxu1 %v129_v11  ;;  %v96_v23 = vperm.slane %v92_v17, 0  ;;  %v95_v25 = vperm.slane %v91_v22, 0 }
   0xb   :  { %138 = vmatmul.msk.bf16.vlgmr.msra.gmra.mxu0 %vm46_vm0, %v21_v12  ;;  %v20_v19 = vld [vmem:[#allocation2] sm:$0xf]  ;;  %v99_v26 = vrot.slane %v96_v23, 6 }
   0xc   :  { %139 = vmatmul.msk.bf16.vlgmr.msra.gmra.mxu1 %vm46_vm0, %v21_v12 }
   0xd   :  { %v100_v29 = vsel %vm79_vm1, %v95_v25, %v99_v26 }
  0x88   :  { %v59_v16 = vpop.f32.mrf.mxu0 }
  0x89   :  { %v72_v18 = vpop.f32.mrf.mxu1 }
  0x8a   :  { %v78_v20 = vrot.slane %v72_v18, 6 }
  0x8c   :  { %v80_v21 = vsel %vm79_vm1, %v59_v16, %v78_v20 }
  0x8d   :  { %v82_v24 = vadd.f32 %v80_v21, %v20_v19 }
  0x8f   :  { %83 = vst [vmem:[#allocation2] sm:$0xf] %v82_v24 }
  0x90   :  { %v61_v27 = vpop.f32.mrf.mxu0 }
  0x91   :  { %v74_v28 = vpop.f32.mrf.mxu1 }
  0x96   :  { %v87_v30 = vld [vmem:[#allocation2] sm:$0xf] }
  0x97   :  { %v102_v31 = vadd.f32 %v100_v29, %v87_v30 }
  0x99   :  { %104 = vst [vmem:[#allocation1] ss:$4 sm:$0xff] %v102_v31 }
  0xa0   :  { %v105_v32 = vld.sshfl [vmem:[#allocation1] sm:$0xff pattern:$0x73625140]  ;;  %v106_v33 = vld.sshfl [vmem:[#allocation1 + $0x8] sm:$0xff pattern:$0x73625140] }
  0xa1   :  { %v109_v34 = vpack.c.bf16 %v106_v33, %v105_v32 }
  0xa3   :  { %v111_v35 = vrot.slane %v109_v34, 3 }
  0xa5   :  { %v115_v36 = vsel %vm112_vm2, %v109_v34, %v111_v35 }
  0xa6   :  { %117 = vst [vmem:[%s202_s3] sm:$0x3] %v115_v36 }

// kernel: bert_forward.26
= control target key start
LH: loop header
LB: loop body
LE: loop exit
PB: predicated region body
PF: predicated region fallthrough
CT: control target
= control target key end

     0   :  { %vm46_vm0 = vcmask 261120   ;;  %v148_v13 = vmov 0.0   ;;  %vm79_vm1 = vcmask 1041408   ;;  %vm113_vm2 = vcmask 1040384   ;;  %s202_s1 = inlined_call_operand.vmem [shape: bf16[32,256], index: 1, kind: input, shape index: {}]   ;;  %s203_s0 = inlined_call_operand.vmem [shape: bf16[2,32], index: 0, kind: input, shape index: {}]   ;;  %s204_s2 = inlined_call_operand.vmem [shape: bf16[1,256], index: 2, kind: input, shape index: {}]   ;;  %s205_s3 = inlined_call_operand.vmem [shape: bf16[2,256], index: 3, kind: output, shape index: {}]  }
   0x1   :  { %v133_v0 = vld [vmem:[%s202_s1 + $0x10] sm:$0xf]  ;;  %v144_v1 = vld [vmem:[%s202_s1 + $0x14] sm:$0xf0]  ;;  %v143_v2 = vld [vmem:[%s202_s1 + $0x14] sm:$0xf] }
   0x2   :  { %v134_v3 = vor.u32 %v144_v1, %v133_v0  ;;  %v135_v4 = vld [vmem:[%s202_s1 + $0x18] sm:$0xf0]  ;;  %v125_v5 = vld [vmem:[%s202_s1] sm:$0xf]  ;;  %v142_v6 = vld [vmem:[%s202_s1 + $0x4] sm:$0xf0] }
   0x3   :  { %v138_v7 = vor.u32 %v143_v2, %v135_v4  ;;  %v141_v8 = vld [vmem:[%s202_s1 + $0x4] sm:$0xf]  ;;  %v127_v9 = vld [vmem:[%s202_s1 + $0x8] sm:$0xf0]  ;;  %v126_v10 = vor.u32 %v142_v6, %v125_v5  ;;  %v21_v12 = vld [vmem:[%s203_s0] sm:$0x1] }
   0x4   :  { %56 = vmatpush.bf16.msra.mxu0 %v134_v3  ;;  %v130_v11 = vor.u32 %v141_v8, %v127_v9  ;;  %19 = vst [vmem:[#allocation2] sm:$0xf] %v148_v13  ;;  %v88_v14 = vld [vmem:[%s204_s2] sm:$0x3] }
   0x5   :  { %69 = vmatpush.bf16.msra.mxu1 %v138_v7  ;;  %v89_v15 = vunpack.c.l.bf16 %v88_v14 }
   0x7   :  { %v92_v17 = vperm.slane %v89_v15, 2  ;;  %v91_v22 = vperm.slane %v89_v15, 0 }
   0x8   :  { %57 = vmatpush.bf16.msra.mxu0 %v126_v10 }
   0x9   :  { %70 = vmatpush.bf16.msra.mxu1 %v130_v11  ;;  %v96_v23 = vperm.slane %v92_v17, 0  ;;  %v95_v25 = vperm.slane %v91_v22, 0 }
   0xb   :  { %139 = vmatmul.msk.bf16.vlgmr.msra.gmra.mxu0 %vm46_vm0, %v21_v12  ;;  %v20_v19 = vld [vmem:[#allocation2] sm:$0xf]  ;;  %v99_v26 = vrot.slane %v96_v23, 6 }
   0xc   :  { %140 = vmatmul.msk.bf16.vlgmr.msra.gmra.mxu1 %vm46_vm0, %v21_v12 }
   0xd   :  { %v100_v29 = vsel %vm79_vm1, %v95_v25, %v99_v26 }
  0x88   :  { %v59_v16 = vpop.f32.mrf.mxu0 }
  0x89   :  { %v72_v18 = vpop.f32.mrf.mxu1 }
  0x8a   :  { %v78_v20 = vrot.slane %v72_v18, 6 }
  0x8c   :  { %v80_v21 = vsel %vm79_vm1, %v59_v16, %v78_v20 }
  0x8d   :  { %v82_v24 = vadd.f32 %v80_v21, %v20_v19 }
  0x8f   :  { %83 = vst [vmem:[#allocation2] sm:$0xf] %v82_v24 }
  0x90   :  { %v61_v27 = vpop.f32.mrf.mxu0 }
  0x91   :  { %v74_v28 = vpop.f32.mrf.mxu1 }
  0x96   :  { %v87_v30 = vld [vmem:[#allocation2] sm:$0xf] }
  0x97   :  { %v102_v31 = vadd.f32 %v100_v29, %v87_v30 }
  0x99   :  { %146 = vtanh.f32 %v102_v31 }
  0x9f   :  { %v147_v32 = vpop.eup %146 }
  0xa0   :  { %105 = vst [vmem:[#allocation1] ss:$4 sm:$0xff] %v147_v32 }
  0xa7   :  { %v106_v33 = vld.sshfl [vmem:[#allocation1] sm:$0xff pattern:$0x73625140]  ;;  %v107_v34 = vld.sshfl [vmem:[#allocation1 + $0x8] sm:$0xff pattern:$0x73625140] }
  0xa8   :  { %v110_v35 = vpack.c.bf16 %v107_v34, %v106_v33 }
  0xaa   :  { %v112_v36 = vrot.slane %v110_v35, 3 }
  0xac   :  { %v116_v37 = vsel %vm113_vm2, %v110_v35, %v112_v36 }
  0xad   :  { %118 = vst [vmem:[%s205_s3] sm:$0x3] %v116_v37 }

</bundles_post_ra>
